<compile_context>
chip_gen: v7x
topology: tpu7x:2x2x1
jax: 0.10.0
libtpu: 0.0.40
codegen_flags: <defaults>
</compile_context>

<pallas_src>
import functools

import jax
import jax.numpy as jnp
from jax.experimental import pallas as pl
from jax.experimental.pallas import tpu as pltpu


def _pick_row_tile(Ho, Wo, kk_cin, itemsize, budget_bytes=2 << 20):
    """Largest output-row tile TH (dividing Ho) whose flattened M = TH*Wo is a
    multiple of 128 lanes and whose im2col slab fits a small VMEM budget."""
    def ok(th):
        return (th * Wo) % 128 == 0 and th * Wo * kk_cin * itemsize <= budget_bytes

    if ok(Ho):
        return Ho
    for th in range(Ho - 1, 0, -1):
        if Ho % th == 0 and ok(th):
            return th
    return Ho  # whole image per step: block == full extent is always legal


def _conv_kernel(x_ref, w_ref, o_ref, *, TH, Wo, K, Cin):
    """One grid step = one batch element x one block of TH output rows.

    x_ref : (1, Hp, Wp, Cin)   padded NHWC image (VMEM; resident across row blocks)
    w_ref : (Cout, K*K*Cin)    flattened weight, columns ordered (kh, kw, cin)
    o_ref : (1, Cout, TH*Wo)   lane-dense output block (flattened NCHW rows)
    """
    row0 = pl.multiple_of(pl.program_id(1) * TH, TH)

    # Build the im2col slab for this row block.
    # One VMEM load per kh; the kw shifts are static slices of the loaded value.
    pieces = []
    for kh in range(K):
        rows = x_ref[0, pl.ds(row0 + kh, TH), :, :]          # (TH, Wp, Cin)
        for kw in range(K):
            pieces.append(rows[:, kw:kw + Wo, :])            # (TH, Wo, Cin)
    # column order: (kh, kw, cin), matching the wrapper's weight flattening
    slab = jnp.concatenate(pieces, axis=-1).reshape(TH * Wo, K * K * Cin)

    # Single MXU contraction of depth K*K*Cin; native dtypes in, f32 accumulate.
    # Contract slab's last dim against w's last dim -> result is already
    # (Cout, M): unmasked, lane-dense store in flattened-NCHW order.
    out = jax.lax.dot_general(
        w_ref[...], slab,
        dimension_numbers=(((1,), (1,)), ((), ())),
        preferred_element_type=jnp.float32,
    )                                                        # (Cout, TH*Wo)
    o_ref[0, :, :] = out.astype(o_ref.dtype)


def conv_layer_forward(x_nchw, weight_oihw, kernel_size):
    """Matches conv_layer.forward: F.conv2d(x, weight, bias=None, padding=k//2)."""
    N, Cin, H, W = x_nchw.shape
    Cout = weight_oihw.shape[0]
    K = kernel_size
    pad = K // 2
    Hp, Wp = H + 2 * pad, W + 2 * pad
    Ho, Wo = Hp - K + 1, Wp - K + 1          # == H, W for odd K

    # Glue (plain JAX): NCHW -> NHWC + spatial zero-pad; one-time weight flatten.
    # (No output transpose is needed: the kernel writes flattened NCHW.)
    x_nhwc = jnp.transpose(x_nchw, (0, 2, 3, 1))                        # (N,H,W,Cin)
    x_pad = jnp.pad(x_nhwc, ((0, 0), (pad, pad), (pad, pad), (0, 0)))   # (N,Hp,Wp,Cin)
    w_flat = jnp.transpose(weight_oihw, (0, 2, 3, 1)).reshape(Cout, K * K * Cin)

    kk_cin = K * K * Cin
    itemsize = jnp.dtype(x_nchw.dtype).itemsize
    TH = _pick_row_tile(Ho, Wo, kk_cin, itemsize)
    n_row_blocks = Ho // TH

    kernel = functools.partial(_conv_kernel, TH=TH, Wo=Wo, K=K, Cin=Cin)

    out_flat = pl.pallas_call(
        kernel,
        out_shape=jax.ShapeDtypeStruct((N, Cout, Ho * Wo), x_nchw.dtype),
        grid_spec=pltpu.PrefetchScalarGridSpec(
            num_scalar_prefetch=0,
            grid=(N, n_row_blocks),
            in_specs=[
                # whole padded image per batch element; block index is constant
                # across the row axis so it stays resident across row blocks
                pl.BlockSpec((1, Hp, Wp, Cin), lambda n, r: (n, 0, 0, 0)),
                # flattened weight, same block for every grid step
                pl.BlockSpec((Cout, kk_cin), lambda n, r: (0, 0)),
            ],
            out_specs=pl.BlockSpec((1, Cout, TH * Wo), lambda n, r: (n, 0, r)),
        ),
        compiler_params=pltpu.CompilerParams(
            # both axes are independent -> megacore / v7x two-TC sharding
            dimension_semantics=("parallel", "parallel"),
        ),
    )(x_pad, w_flat)

    # free reshape: (N, Cout, Ho*Wo) -> NCHW
    return out_flat.reshape(N, Cout, Ho, Wo)


def xavier_normal_weight(key, ch_out, ch_in, k):
    """Deterministic equivalent of nn.init.xavier_normal_ for a conv weight."""
    fan_in = ch_in * k * k
    fan_out = ch_out * k * k
    std = (2.0 / (fan_in + fan_out)) ** 0.5
    return std * jax.random.normal(key, (ch_out, ch_in, k, k), dtype=jnp.float32)


if __name__ == "__main__":
    key = jax.random.PRNGKey(0)
    k_x, k_w = jax.random.split(key)

    N, Cin, Cout, H, W, K = 2, 4, 8, 16, 16, 3
    x = jax.random.normal(k_x, (N, Cin, H, W), dtype=jnp.float32)
    weight = xavier_normal_weight(k_w, Cout, Cin, K)

    out = conv_layer_forward(x, weight, K)
    out = jax.block_until_ready(out)

    # sanity check against XLA's conv (same semantics as F.conv2d, padding=k//2)
    ref = jax.lax.conv_general_dilated(
        x, weight,
        window_strides=(1, 1),
        padding=((K // 2, K // 2), (K // 2, K // 2)),
        dimension_numbers=("NCHW", "OIHW", "NCHW"),
    )
    assert out.shape == (N, Cout, H, W)
    assert jnp.max(jnp.abs(out - ref)) < 1e-4

    print("KERNEL_OK")
</pallas_src>

<mosaic_0001>
module attributes {stable_mosaic.version = 11 : i64} {
  func.func @_conv_kernel(%arg0: i32, %arg1: i32, %arg2: memref<1x18x18x4xf32, #tpu.memory_space<vmem>>, %arg3: memref<8x36xf32, #tpu.memory_space<vmem>>, %arg4: memref<1x8x256xf32, #tpu.memory_space<vmem>>) attributes {dimension_semantics = [#tpu.dimension_semantics<parallel>, #tpu.dimension_semantics<parallel>], iteration_bounds = array<i64: 2, 1>, scalar_prefetch = 0 : i64, scratch_operands = 0 : i64, tpu.core_type = #tpu.core_type<tc>, window_params = [{transform_indices = @transform_0, window_bounds = array<i64: 1, 18, 18, 4>}, {pipeline_mode = #tpu.pipeline_mode<synchronous>, transform_indices = @transform_1, window_bounds = array<i64: 8, 36>}, {transform_indices = @transform_2, window_bounds = array<i64: 1, 8, 256>}]} {
    %c16_i32 = arith.constant 16 : i32
    %0 = arith.muli %arg1, %c16_i32 : i32
    %1 = tpu.assume_multiple %0, 16 : i32
    %c0_i32 = arith.constant 0 : i32
    %2 = arith.addi %1, %c0_i32 : i32
    %c0 = arith.constant 0 : index
    %3 = arith.index_cast %2 : i32 to index
    %c0_0 = arith.constant 0 : index
    %c0_1 = arith.constant 0 : index
    %4 = vector.load %arg2[%c0, %3, %c0_0, %c0_1] : memref<1x18x18x4xf32, #tpu.memory_space<vmem>>, vector<1x16x18x4xf32>
    %5 = vector.shape_cast %4 : vector<1x16x18x4xf32> to vector<16x18x4xf32>
    %6 = vector.extract_strided_slice %5 {offsets = [0, 0, 0], sizes = [16, 16, 4], strides = [1, 1, 1]} : vector<16x18x4xf32> to vector<16x16x4xf32>
    %7 = vector.extract_strided_slice %5 {offsets = [0, 1, 0], sizes = [16, 16, 4], strides = [1, 1, 1]} : vector<16x18x4xf32> to vector<16x16x4xf32>
    %8 = vector.extract_strided_slice %5 {offsets = [0, 2, 0], sizes = [16, 16, 4], strides = [1, 1, 1]} : vector<16x18x4xf32> to vector<16x16x4xf32>
    %c1_i32 = arith.constant 1 : i32
    %9 = arith.addi %1, %c1_i32 : i32
    %c0_2 = arith.constant 0 : index
    %10 = arith.index_cast %9 : i32 to index
    %c0_3 = arith.constant 0 : index
    %c0_4 = arith.constant 0 : index
    %11 = vector.load %arg2[%c0_2, %10, %c0_3, %c0_4] : memref<1x18x18x4xf32, #tpu.memory_space<vmem>>, vector<1x16x18x4xf32>
    %12 = vector.shape_cast %11 : vector<1x16x18x4xf32> to vector<16x18x4xf32>
    %13 = vector.extract_strided_slice %12 {offsets = [0, 0, 0], sizes = [16, 16, 4], strides = [1, 1, 1]} : vector<16x18x4xf32> to vector<16x16x4xf32>
    %14 = vector.extract_strided_slice %12 {offsets = [0, 1, 0], sizes = [16, 16, 4], strides = [1, 1, 1]} : vector<16x18x4xf32> to vector<16x16x4xf32>
    %15 = vector.extract_strided_slice %12 {offsets = [0, 2, 0], sizes = [16, 16, 4], strides = [1, 1, 1]} : vector<16x18x4xf32> to vector<16x16x4xf32>
    %c2_i32 = arith.constant 2 : i32
    %16 = arith.addi %1, %c2_i32 : i32
    %c0_5 = arith.constant 0 : index
    %17 = arith.index_cast %16 : i32 to index
    %c0_6 = arith.constant 0 : index
    %c0_7 = arith.constant 0 : index
    %18 = vector.load %arg2[%c0_5, %17, %c0_6, %c0_7] : memref<1x18x18x4xf32, #tpu.memory_space<vmem>>, vector<1x16x18x4xf32>
    %19 = vector.shape_cast %18 : vector<1x16x18x4xf32> to vector<16x18x4xf32>
    %20 = vector.extract_strided_slice %19 {offsets = [0, 0, 0], sizes = [16, 16, 4], strides = [1, 1, 1]} : vector<16x18x4xf32> to vector<16x16x4xf32>
    %21 = vector.extract_strided_slice %19 {offsets = [0, 1, 0], sizes = [16, 16, 4], strides = [1, 1, 1]} : vector<16x18x4xf32> to vector<16x16x4xf32>
    %22 = vector.extract_strided_slice %19 {offsets = [0, 2, 0], sizes = [16, 16, 4], strides = [1, 1, 1]} : vector<16x18x4xf32> to vector<16x16x4xf32>
    %23 = tpu.concatenate %6, %7, %8, %13, %14, %15, %20, %21, %22 in 2 : vector<16x16x4xf32>, vector<16x16x4xf32>, vector<16x16x4xf32>, vector<16x16x4xf32>, vector<16x16x4xf32>, vector<16x16x4xf32>, vector<16x16x4xf32>, vector<16x16x4xf32>, vector<16x16x4xf32> -> vector<16x16x36xf32>
    %24 = vector.shape_cast %23 : vector<16x16x36xf32> to vector<256x36xf32>
    %c0_8 = arith.constant 0 : index
    %c0_9 = arith.constant 0 : index
    %25 = vector.load %arg3[%c0_8, %c0_9] : memref<8x36xf32, #tpu.memory_space<vmem>>, vector<8x36xf32>
    %cst = arith.constant dense<0.000000e+00> : vector<8x256xf32>
    %26 = tpu.matmul %25, %24, %cst {dimension_numbers = #tpu.dot_dimension_numbers<[1], [1], [0], [0], [0, 0, 1, 0], [], []>} : vector<8x36xf32>, vector<256x36xf32>, vector<8x256xf32> -> vector<8x256xf32>
    %c0_10 = arith.constant 0 : index
    %c0_11 = arith.constant 0 : index
    %c0_12 = arith.constant 0 : index
    %27 = vector.load %arg4[%c0_10, %c0_11, %c0_12] : memref<1x8x256xf32, #tpu.memory_space<vmem>>, vector<1x8x256xf32>
    %28 = vector.shape_cast %27 : vector<1x8x256xf32> to vector<8x256xf32>
    %29 = vector.shape_cast %26 : vector<8x256xf32> to vector<1x8x256xf32>
    tpu.vector_store %arg4[%c0_10, %c0_11, %c0_12], %29 {strides = array<i32>} : memref<1x8x256xf32, #tpu.memory_space<vmem>>, vector<1x8x256xf32>,
    return
  }
  func.func @transform_0(%arg0: i32, %arg1: i32) -> (i32, i32, i32, i32) {
    %c0_i32 = arith.constant 0 : i32
    %c0_i32_0 = arith.constant 0 : i32
    %c0_i32_1 = arith.constant 0 : i32
    %c0_i32_2 = arith.constant 0 : i32
    return %arg0, %c0_i32, %c0_i32_0, %c0_i32_1 : i32, i32, i32, i32
  }
  func.func @transform_1(%arg0: i32, %arg1: i32) -> (i32, i32) {
    %c0_i32 = arith.constant 0 : i32
    %c0_i32_0 = arith.constant 0 : i32
    %c0_i32_1 = arith.constant 0 : i32
    return %c0_i32, %c0_i32_0 : i32, i32
  }
  func.func @transform_2(%arg0: i32, %arg1: i32) -> (i32, i32, i32) {
    %c0_i32 = arith.constant 0 : i32
    %c0_i32_0 = arith.constant 0 : i32
    return %arg0, %c0_i32, %arg1 : i32, i32, i32
  }
}

</mosaic_0001>

<bundles_post_ra>
// kernel: tpu_custom_call.1
= control target key start
LH: loop header
LB: loop body
LE: loop exit
PB: predicated region body
PF: predicated region fallthrough
CT: control target
= control target key end

     0   :  { %7 = vsyncpa [#allocation3], 0  ;;  %s5384_s0 = inlined_call_operand.vmem [shape: f32[2,18,18,4], index: 0, kind: input, shape index: {}]   ;;  %s5385_s1 = inlined_call_operand.vmem [shape: f32[8,36], index: 1, kind: input, shape index: {}]   ;;  %s5386_s2 = inlined_call_operand.hbm [shape: f32[2,8,256], index: 2, kind: output, shape index: {}]  }
   0x1   :  { %9 = vsyncpa [#allocation3 + $0x1], 0  ;;  %s3302_s9 = smov 0   ;;  %s3304_s10 = smov 0  }
   0x2   :  { %s3306_s11 = smov 0   ;;  %s3308_s12 = smov 0  }
   0x3   :  { %s3310_s13 = smov 0   ;;  %s3312_s14 = smov 0  }
   0x4 LB: > { %s2239_s15 = sadd.s32 4294967295, %s3276_s14   ;;  %s2240_s16 = sadd.s32 4294967294, %s3276_s14   ;;  %s3276_s14 = sphi %s3312_s14, %s15_s14   ;;  %s3272_s13 = sphi %s3310_s13, %s5656_s13   ;;  %s3268_s12 = sphi %s3308_s12, %s5655_s12   ;;  %s3264_s11 = sphi %s3306_s11, %s5654_s11   ;;  %s3260_s10 = sphi %s3304_s10, %s5653_s10   ;;  %s3256_s9 = sphi %s3302_s9, %s5652_s9  }
   0x5   : > { %s27_s17 = sadd.s32 1, %s3272_s13  ;;  %s83_s18 = sadd.s32 1, %s3264_s11 }
   0x6   : > { %p29_p0 = scmp.ge.s32.totalorder %s27_s17, 2  ;;  %p93_p1 = scmp.ne.s32.totalorder %s3264_s11, %s3260_s10 }
   0x7   : > { %p94_p2 = scmp.eq.s32.totalorder %s2239_s15, 1  ;;  %p99_p3 = scmp.ne.s32.totalorder %s3260_s10, %s3256_s9 }
   0x8   : > { %s5658_s17 = smov (%p29_p0, %s27_s17), 0  ;;  %p100_p5 = scmp.eq.s32.totalorder %s2240_s16, 1 }
   0x9   : > { %p3342_p4 = por %p94_p2, %p93_p1  ;;  %s78_s20 = ssub.s32 %s3272_s13, %s5658_s17 }
   0xa   : > { %p2243_p6 = scmp.ge.s32.totalorder %s3276_s14, 1  ;;  %p81_p7 = scmp.eq.s32.totalorder %s78_s20, 0 }
   0xb   : > { %p3349_p8 = por %p100_p5, %p99_p3  ;;  %p129_p9 = scmp.lt.s32.totalorder %s3276_s14, 3 }
   0xc   : > { %s3355_s22 = scalar_select %p81_p7, %s3264_s11, %s83_s18  }
   0xd   : > { %p130_p10 = pnand %p2243_p6, %p129_p9 }
   0xf   : > { %133 = sbr.rel (%p130_p10) target bundleno = 647 (0x287), region = 28 }
  0x16   : > { %p151_p11 = scmp.lt.s32.totalorder %s3268_s12, 1  ;;  %vm358_vm0 = vcmask 1046528   ;;  %s3278_s28 = smov 4   ;;  %vm535_vm1 = vcmask 1045504   ;;  %vm1704_vm2 = vcmask 31744   ;;  %vm1737_vm3 = vcmask 64512  }
  0x17   : > { %s3279_s29 = smov 8   ;;  %s3280_s30 = smov 12   ;;  %vm1770_vm4 = vcmask 97280   ;;  %vm1803_vm5 = vcmask 130048   ;;  %vm1836_vm6 = vcmask 162816   ;;  %vm1869_vm7 = vcmask 195584  }
  0x18   : > { %s152_s23 = scalar_select %p151_p11, %s3268_s12, 1  ;;  %vm1902_vm8 = vcmask 228352   ;;  %vm1935_vm9 = vcmask 261120   ;;  %vm1969_vm10 = vcmask 293888  }
  0x19   : > { %s3281_s3 = smov 16   ;;  %s3282_s4 = smov 20   ;;  %vm4898_vm11 = vmpackc.low %vm1969_vm10, %vm1969_vm10 }
  0x1a   : > { %s2463_s24 = smul.u32 432, %s152_s23  ;;  %s3283_s5 = smov 24  }
  0x1b   : > { %s3284_s6 = smov 28   ;;  %s3285_s7 = smov 32  }
  0x1c   : > { %s3362_s27 = scalar_lea.vmem %s5384_s0, %s2463_s24  ;;  %s148_s16 = sand.u32 1, %s3260_s10  }
  0x1d   : > { %v3365_v0 = vld [vmem:[%s3362_s27 + $0x30] sm:$0xff]  ;;  %v3368_v1 = vld [vmem:[%s3362_s27 + $0x38] sm:$0xff]  ;;  %v3371_v2 = vld [vmem:[%s3362_s27 + $0x40] sm:$0x3]  ;;  %s2244_s18 = sshll.u32 %s148_s16, 4  ;;  %s2380_s24 = sshll.u32 %s3268_s12, 8 }
  0x1e   : > { %v369_v3 = vrot.slane %v3365_v0, 1  ;;  %v3375_v4 = vrot.slane %v3368_v1, 1  ;;  %v372_v5 = vrot.slane %v3371_v2, 1  ;;  %v3379_v6 = vld [vmem:[%s3362_s27] sm:$0xff]  ;;  %v3382_v7 = vld [vmem:[%s3362_s27 + $0x8] sm:$0xff]  ;;  %v3393_v12 = vld [vmem:[%s3362_s27 + $0x50] sm:$0xff] }
  0x1f   : > { %v3385_v8 = vld [vmem:[%s3362_s27 + $0x10] sm:$0x3]  ;;  %v359_v9 = vrot.slane %v3379_v6, 1  ;;  %v360_v10 = vrot.slane %v3382_v7, 1  ;;  %v3390_v11 = vld [vmem:[%s3362_s27 + $0x48] sm:$0xff]  ;;  %v3406_v17 = vld [vmem:[%s3362_s27 + $0x18] sm:$0xff] }
  0x20   : > { %5462 = vst [vmem:[#allocation5_spill] sm:$0xff] %v3375_v4  ;;  %v3397_v13 = vsel %vm358_vm0, %v369_v3, %v3375_v4  ;;  %v373_v14 = vsel %vm358_vm0, %v3375_v4, %v372_v5  ;;  %v362_v15 = vrot.slane %v3385_v8, 1  ;;  %v3403_v16 = vld [vmem:[%s3362_s27 + $0x58] sm:$0x3]  ;;  %v3409_v18 = vld [vmem:[%s3362_s27 + $0x20] sm:$0xff]  ;;  %v374_v21 = vrot.slane %v3390_v11, 1 }
  0x21   : > { %5463 = vst [vmem:[#allocation6_spill] sm:$0xff] %v3397_v13  ;;  %5464 = vst [vmem:[#allocation7_spill] sm:$0xff] %v3409_v18  ;;  %v2537_v19 = vpack.i.bf16 %v373_v14, %v3397_v13  ;;  %v361_v20 = vsel %vm358_vm0, %v359_v9, %v360_v10  ;;  %v3415_v22 = vrot.slane %v3393_v12, 1  ;;  %v3418_v23 = vld [vmem:[%s3362_s27 + $0x28] sm:$0x3]  ;;  %v3421_v24 = vld [vmem:[%s3362_s27 + $0x78] sm:$0xff] }
  0x22   : > { %v3424_v25 = vld [vmem:[%s3362_s27 + $0x80] sm:$0xff]  ;;  %v363_v26 = vsel %vm358_vm0, %v360_v10, %v362_v15  ;;  %v377_v27 = vrot.slane %v3403_v16, 1  ;;  %v364_v28 = vrot.slane %v3406_v17, 1  ;;  %v3430_v29 = vrot.slane %v3409_v18, 1  ;;  %v3433_v30 = vld [vmem:[%s3362_s27 + $0x88] sm:$0x3] }
  0x23   : > { %5465 = vst [vmem:[#allocation8_spill] sm:$0xff] %v3415_v22  ;;  %v3436_v31 = vld [vmem:[%s3362_s27 + $0x60] sm:$0xff]  ;;  %2538 = vrot.lane.b32.xlu1 %v2537_v19, %s3278_s28  ;;  %v2527_v32 = vpack.i.bf16 %v363_v26, %v361_v20  ;;  %v3441_v33 = vsel %vm358_vm0, %v374_v21, %v3415_v22  ;;  %v367_v34 = vrot.slane %v3418_v23, 1  ;;  %v384_v35 = vrot.slane %v3421_v24, 1  ;;  %v3446_v36 = vld [vmem:[%s3362_s27 + $0x68] sm:$0xff]  ;;  %v3465_v43 = vld [vmem:[%s3362_s27 + $0xb0] sm:$0xff] }
  0x24   : > { %5466 = vst [vmem:[#allocation9_spill] sm:$0xff] %v3430_v29  ;;  %5467 = vst [vmem:[#allocation10_spill] sm:$0xff] %v3441_v33  ;;  %v3449_v37 = vld [vmem:[%s3362_s27 + $0x70] sm:$0x3]  ;;  %v378_v38 = vsel %vm358_vm0, %v3415_v22, %v377_v27  ;;  %v3455_v39 = vsel %vm358_vm0, %v364_v28, %v3430_v29  ;;  %v3458_v40 = vrot.slane %v3424_v25, 1  ;;  %v387_v41 = vrot.slane %v3433_v30, 1 }
  0x25   : > { %5468 = vst [vmem:[#allocation11_spill] sm:$0xff] %v3455_v39  ;;  %v3462_v42 = vld [vmem:[%s3362_s27 + $0xa8] sm:$0xff]  ;;  %2528 = vrot.lane.b32.xlu0 %v2527_v32, %s3278_s28  ;;  %v2542_v44 = vpack.i.bf16 %v378_v38, %v3441_v33  ;;  %v368_v45 = vsel %vm358_vm0, %v3430_v29, %v367_v34  ;;  %v379_v46 = vrot.slane %v3436_v31, 1  ;;  %v3473_v47 = vrot.slane %v3446_v36, 1  ;;  %v3476_v48 = vld [vmem:[%s3362_s27 + $0xb8] sm:$0x3] }
  0x26   : > { %5469 = vst [vmem:[#allocation12_spill] sm:$0xff] %v3458_v40  ;;  %v3479_v49 = vld [vmem:[%s3362_s27 + $0x90] sm:$0xff]  ;;  %v3482_v50 = vld [vmem:[%s3362_s27 + $0x98] sm:$0xff]  ;;  %v2532_v51 = vpack.i.bf16 %v368_v45, %v3455_v39  ;;  %v3487_v52 = vsel %vm358_vm0, %v384_v35, %v3458_v40  ;;  %v388_v53 = vsel %vm358_vm0, %v3458_v40, %v387_v41  ;;  %v382_v54 = vrot.slane %v3449_v37, 1  ;;  %v3493_v55 = vld [vmem:[%s3362_s27 + $0xa0] sm:$0x3] }
  0x27   : > { %5470 = vst [vmem:[#allocation13_spill] sm:$0xff] %v3473_v47  ;;  %5471 = vst [vmem:[#allocation14_spill] sm:$0xff] %v3487_v52  ;;  %v3496_v56 = vld [vmem:[%s3362_s27 + $0xd8] sm:$0xff]  ;;  %2543 = vrot.lane.b32.xlu1 %v2542_v44, %s3278_s28  ;;  %v2552_v57 = vpack.i.bf16 %v388_v53, %v3487_v52  ;;  %v3502_v58 = vsel %vm358_vm0, %v379_v46, %v3473_v47  ;;  %v394_v59 = vrot.slane %v3462_v42, 1  ;;  %v3506_v60 = vrot.slane %v3465_v43, 1  ;;  %v3509_v61 = vld [vmem:[%s3362_s27 + $0xe0] sm:$0xff] }
  0x28   : > { %5472 = vst [vmem:[#allocation15_spill] sm:$0xff] %v3502_v58  ;;  %v3512_v62 = vld [vmem:[%s3362_s27 + $0xe8] sm:$0x3]  ;;  %v383_v63 = vsel %vm358_vm0, %v3473_v47, %v382_v54  ;;  %v397_v3 = vrot.slane %v3476_v48, 1  ;;  %v389_v5 = vrot.slane %v3479_v49, 1  ;;  %v3519_v9 = vrot.slane %v3482_v50, 1 }
  0x29   : > { %5473 = vst [vmem:[#allocation16_spill] sm:$0xff] %v3506_v60  ;;  %v3522_v10 = vld [vmem:[%s3362_s27 + $0xc0] sm:$0xff]  ;;  %v3525_v14 = vld [vmem:[%s3362_s27 + $0xc8] sm:$0xff]  ;;  %2533 = vrot.lane.b32.xlu0 %v2532_v51, %s3278_s28  ;;  %v2547_v15 = vpack.i.bf16 %v383_v63, %v3502_v58  ;;  %v3531_v19 = vsel %vm358_vm0, %v394_v59, %v3506_v60  ;;  %v392_v20 = vrot.slane %v3493_v55, 1  ;;  %v404_v21 = vrot.slane %v3496_v56, 1  ;;  %v3552_v38 = vld [vmem:[%s3362_s27 + $0x110] sm:$0xff] }
  0x2a   : > { %5474 = vst [vmem:[#allocation17_spill] sm:$0xff] %v3519_v9  ;;  %5475 = vst [vmem:[#allocation18_spill] sm:$0xff] %v3531_v19  ;;  %v3536_v26 = vld [vmem:[%s3362_s27 + $0xd0] sm:$0x3]  ;;  %v398_v27 = vsel %vm358_vm0, %v3506_v60, %v397_v3  ;;  %v3542_v28 = vsel %vm358_vm0, %v389_v5, %v3519_v9  ;;  %v3545_v32 = vrot.slane %v3509_v61, 1  ;;  %v407_v34 = vrot.slane %v3512_v62, 1 }
  0x2b   : > { %5476 = vst [vmem:[#allocation19_spill] sm:$0xff] %v3542_v28  ;;  %v3549_v35 = vld [vmem:[%s3362_s27 + $0x108] sm:$0xff]  ;;  %2553 = vrot.lane.b32.xlu1 %v2552_v57, %s3278_s28  ;;  %v2562_v41 = vpack.i.bf16 %v398_v27, %v3531_v19  ;;  %v393_v44 = vsel %vm358_vm0, %v3519_v9, %v392_v20  ;;  %v399_v45 = vrot.slane %v3522_v10, 1  ;;  %v3560_v46 = vrot.slane %v3525_v14, 1  ;;  %v3563_v51 = vld [vmem:[%s3362_s27 + $0x118] sm:$0x3] }
  0x2c   : > { %5477 = vst [vmem:[#allocation20_spill] sm:$0xff] %v3545_v32  ;;  %v3566_v53 = vld [vmem:[%s3362_s27 + $0xf0] sm:$0xff]  ;;  %v3569_v54 = vld [vmem:[%s3362_s27 + $0xf8] sm:$0xff]  ;;  %v3573_v57 = vsel %vm358_vm0, %v404_v21, %v3545_v32  ;;  %v408_v59 = vsel %vm358_vm0, %v3545_v32, %v407_v34  ;;  %v402_v63 = vrot.slane %v3536_v26, 1  ;;  %v3579_v3 = vld [vmem:[%s3362_s27 + $0x100] sm:$0x3]  ;;  %v2557_v20 = vpack.i.bf16 %v393_v44, %v3542_v28 }
  0x2d   : > { %5478 = vst [vmem:[#allocation21_spill] sm:$0xff] %v3560_v46  ;;  %5479 = vst [vmem:[#allocation22_spill] sm:$0xff] %v3573_v57  ;;  %v3582_v5 = vld [vmem:[%s3362_s27 + $0x138] sm:$0xff]  ;;  %2548 = vrot.lane.b32.xlu0 %v2547_v15, %s3278_s28  ;;  %v3588_v27 = vsel %vm358_vm0, %v399_v45, %v3560_v46  ;;  %v414_v21 = vrot.slane %v3549_v35, 1  ;;  %v3592_v34 = vrot.slane %v3552_v38, 1  ;;  %v3595_v19 = vld [vmem:[%s3362_s27 + $0x140] sm:$0xff]  ;;  %v2572_v40 = vpack.i.bf16 %v408_v59, %v3573_v57 }
  0x2e   : > { %5480 = vst [vmem:[#allocation23_spill] sm:$0xff] %v3588_v27  ;;  %v3598_v60 = vld [vmem:[%s3362_s27 + $0x148] sm:$0x3]  ;;  %v403_v9 = vsel %vm358_vm0, %v3560_v46, %v402_v63  ;;  %v417_v15 = vrot.slane %v3563_v51, 1  ;;  %v409_v44 = vrot.slane %v3566_v53, 1  ;;  %v3605_v45 = vrot.slane %v3569_v54, 1 }
  0x2f   : > { %5481 = vst [vmem:[#allocation24_spill] sm:$0xff] %v3592_v34  ;;  %5482 = vst [vmem:[#allocation25_spill] sm:$0xff] %v3598_v60  ;;  %v3608_v28 = vld [vmem:[%s3362_s27 + $0x120] sm:$0xff]  ;;  %v3611_v52 = vld [vmem:[%s3362_s27 + $0x128] sm:$0xff]  ;;  %2563 = vrot.lane.b32.xlu1 %v2562_v41, %s3278_s28  ;;  %v3617_v63 = vsel %vm358_vm0, %v414_v21, %v3592_v34  ;;  %v412_v46 = vrot.slane %v3579_v3, 1  ;;  %v424_v58 = vrot.slane %v3582_v5, 1  ;;  %v2567_v4 = vpack.i.bf16 %v403_v9, %v3588_v27 }
  0x30   : > { %5483 = vst [vmem:[#allocation26_spill] sm:$0xff] %v3605_v45  ;;  %5484 = vst [vmem:[#allocation27_spill] sm:$0xff] %v3608_v28  ;;  %v3622_v47 = vld [vmem:[%s3362_s27 + $0x130] sm:$0x3]  ;;  %v418_v33 = vsel %vm358_vm0, %v3592_v34, %v417_v15  ;;  %v3628_v41 = vsel %vm358_vm0, %v409_v44, %v3605_v45  ;;  %v425_v59 = vrot.slane %v3595_v19, 1  ;;  %v427_v21 = vrot.slane %v3598_v60, 1 }
  0x31   : > { %5485 = vst [vmem:[#allocation28_spill] sm:$0xff] %v3611_v52  ;;  %5486 = vst [vmem:[#allocation29_spill] sm:$0xff] %v3617_v63  ;;  %v3633_v22 = vld [vmem:[%s3362_s27 + $0x168] sm:$0xff]  ;;  %v3636_v13 = vld [vmem:[%s3362_s27 + $0x170] sm:$0xff]  ;;  %2558 = vrot.lane.b32.xlu0 %v2557_v20, %s3278_s28  ;;  %v413_v15 = vsel %vm358_vm0, %v3605_v45, %v412_v46  ;;  %v419_v34 = vrot.slane %v3608_v28, 1  ;;  %v3644_v44 = vrot.slane %v3611_v52, 1  ;;  %v2582_v29 = vpack.i.bf16 %v418_v33, %v3617_v63 }
  0x32   : > { %5487 = vst [vmem:[#allocation30_spill] sm:$0xff] %v3622_v47  ;;  %5488 = vst [vmem:[#allocation31_spill] sm:$0xff] %v3628_v41  ;;  %v3647_v39 = vld [vmem:[%s3362_s27 + $0x178] sm:$0x3]  ;;  %v422_v57 = vrot.slane %v3622_v47, 1  ;;  %v3652_v32 = vld [vmem:[%s3362_s27 + $0x150] sm:$0xff]  ;;  %v2577_v9 = vpack.i.bf16 %v413_v15, %v3628_v41  ;;  %v426_v46 = vsel %vm358_vm0, %v424_v58, %v425_v59  ;;  %v428_v33 = vsel %vm358_vm0, %v425_v59, %v427_v21 }
  0x33   : > { %5489 = vst [vmem:[#allocation32_spill] sm:$0xff] %v3644_v44  ;;  %v3655_v60 = vld [vmem:[%s3362_s27 + $0x158] sm:$0xff]  ;;  %v3658_v20 = vld [vmem:[%s3362_s27 + $0x160] sm:$0x3]  ;;  %2573 = vrot.lane.b32.xlu1 %v2572_v40, %s3278_s28  ;;  %v434_v27 = vrot.slane %v3633_v22, 1  ;;  %v435_v45 = vrot.slane %v3636_v13, 1  ;;  %v3668_v63 = vsel %vm358_vm0, %v419_v34, %v3644_v44 }
  0x34   : > { %5490 = vst [vmem:[#allocation33_spill] sm:$0xff] %v3655_v60  ;;  %5491 = vst [vmem:[#allocation34_spill] sm:$0xff] %v3658_v20  ;;  %v423_v47 = vsel %vm358_vm0, %v3644_v44, %v422_v57  ;;  %v437_v52 = vrot.slane %v3647_v39, 1  ;;  %v429_v58 = vrot.slane %v3652_v32, 1  ;;  %v430_v15 = vrot.slane %v3655_v60, 1  ;;  %s150_s20 = scalar_lea.vmem [#allocation2], %s2244_s18 }
  0x35   : > { %2568 = vrot.lane.b32.xlu0 %v2567_v4, %s3278_s28  ;;  %v436_v40 = vsel %vm358_vm0, %v434_v27, %v435_v45  ;;  %v432_v41 = vrot.slane %v3658_v20, 1  ;;  %v541_v34 = vrot.slane %v3406_v17, 2  ;;  %v3681_v21 = vrot.slane %v3409_v18, 2  ;;  %s2159_s23 = sshll.u32 %s150_s20, 4  ;;  %s3286_s12 = smov [#allocation2]   ;;  %s5334_s23 = int_to_ptr.vmem [resolvable:$true] %s2159_s23 }
  0x36   : > { %v438_v59 = vsel %vm358_vm0, %v435_v45, %v437_v52  ;;  %v544_v57 = vrot.slane %v3418_v23, 2  ;;  %v539_v44 = vrot.slane %v3385_v8, 2  ;;  %v2592_v4 = vpack.i.bf16 %v428_v33, %v426_v46 }
  0x37   : > { %5492 = vst [vmem:[#allocation35_spill] sm:$0xff] %v3681_v21  ;;  %2583 = vrot.lane.b32.xlu1 %v2582_v29, %s3278_s28  ;;  %v536_v27 = vrot.slane %v3379_v6, 2  ;;  %v537_v60 = vrot.slane %v3382_v7, 2  ;;  %v549_v20 = vrot.slane %v3371_v2, 2  ;;  %v2587_v52 = vpack.i.bf16 %v423_v47, %v3668_v63 }
  0x38   : > { %v2602_v45 = vpack.i.bf16 %v438_v59, %v436_v40  ;;  %v431_v18 = vsel %vm358_vm0, %v429_v58, %v430_v15  ;;  %v433_v23 = vsel %vm358_vm0, %v430_v15, %v432_v41  ;;  %v3695_v8 = vsel %vm535_vm1, %v541_v34, %v3681_v21 }
  0x39   : > { %2578 = vrot.lane.b32.xlu0 %v2577_v9, %s3278_s28  ;;  %5493 = vst [vmem:[#allocation36_spill] sm:$0xff] %v3695_v8  ;;  %v545_v6 = vsel %vm535_vm1, %v3681_v21, %v544_v57  ;;  %v551_v7 = vrot.slane %v3390_v11, 2  ;;  %v538_v2 = vsel %vm535_vm1, %v536_v27, %v537_v60  ;;  %v540_v29 = vsel %vm535_vm1, %v537_v60, %v539_v44 }
  0x3a   : > { %v3704_v47 = vrot.slane %v3393_v12, 2  ;;  %v554_v41 = vrot.slane %v3403_v16, 2  ;;  %v546_v9 = vrot.slane %v3365_v0, 2  ;;  %v3709_v46 = vrot.slane %v3368_v1, 2 }
  0x3b   : > { %2593 = vrot.lane.b32.xlu1 %v2592_v4, %s3278_s28  ;;  %v561_v33 = vrot.slane %v3421_v24, 2  ;;  %v3713_v40 = vrot.slane %v3424_v25, 2  ;;  %v2597_v58 = vpack.i.bf16 %v433_v23, %v431_v18  ;;  %v564_v60 = vrot.slane %v3433_v30, 2 }
  0x3c   : > { %v2612_v44 = vpack.i.bf16 %v545_v6, %v3695_v8  ;;  %v2607_v16 = vpack.i.bf16 %v540_v29, %v538_v2  ;;  %v3721_v15 = vsel %vm535_vm1, %v551_v7, %v3704_v47  ;;  %v555_v59 = vsel %vm535_vm1, %v3704_v47, %v554_v41  ;;  %v5500_v8 = vld [vmem:[#allocation25_spill] sm:$0xff] }
  0x3d   : > { %2588 = vrot.lane.b32.xlu0 %v2587_v52, %s3278_s28  ;;  %v3727_v34 = vsel %vm535_vm1, %v546_v9, %v3709_v46  ;;  %v550_v18 = vsel %vm535_vm1, %v3709_v46, %v549_v20  ;;  %v3733_v30 = vsel %vm535_vm1, %v561_v33, %v3713_v40  ;;  %v556_v57 = vrot.slane %v3436_v31, 2 }
  0x3e   : > { %v565_v4 = vsel %vm535_vm1, %v3713_v40, %v564_v60  ;;  %v3740_v27 = vrot.slane %v3446_v36, 2  ;;  %v559_v52 = vrot.slane %v3449_v37, 2  ;;  %v3745_v20 = vrot.slane %v3465_v43, 2 }
  0x3f   : > { %2603 = vrot.lane.b32.xlu1 %v2602_v45, %s3278_s28  ;;  %v571_v45 = vrot.slane %v3462_v42, 2  ;;  %v574_v23 = vrot.slane %v3476_v48, 2  ;;  %v566_v6 = vrot.slane %v3479_v49, 2  ;;  %v3750_v7 = vrot.slane %v3482_v50, 2 }
  0x40   : > { %5494 = vst [vmem:[#allocation37_spill] sm:$0xff] %v3745_v20  ;;  %v2622_v2 = vpack.i.bf16 %v555_v59, %v3721_v15  ;;  %v569_v29 = vrot.slane %v3493_v55, 2  ;;  %v2617_v37 = vpack.i.bf16 %v550_v18, %v3727_v34  ;;  %v2632_v41 = vpack.i.bf16 %v565_v4, %v3733_v30 }
  0x41   : > { %2598 = vrot.lane.b32.xlu0 %v2597_v58, %s3278_s28  ;;  %5495 = vst [vmem:[#allocation38_spill] sm:$0xff] %v3750_v7  ;;  %v3760_v48 = vsel %vm535_vm1, %v556_v57, %v3740_v27  ;;  %v560_v9 = vsel %vm535_vm1, %v3740_v27, %v559_v52  ;;  %v3766_v33 = vsel %vm535_vm1, %v571_v45, %v3745_v20  ;;  %v581_v60 = vrot.slane %v3496_v56, 2  ;;  %s2143_s28 = scalar_lea.sflag [#allocation3], %s148_s16 }
  0x42   : > { %5496 = vst [vmem:[#allocation39_spill] sm:$0xff] %v3766_v33  ;;  %v575_v55 = vsel %vm535_vm1, %v3745_v20, %v574_v23  ;;  %v3772_v58 = vsel %vm535_vm1, %v566_v6, %v3750_v7  ;;  %v584_v59 = vrot.slane %v3512_v62, 2  ;;  %v576_v18 = vrot.slane %v3522_v10, 2 }
  0x43   : > { %2613 = vrot.lane.b32.xlu1 %v2612_v44, %s3279_s29  ;;  %5497 = vst [vmem:[#allocation40_spill] sm:$0xff] %v3772_v58  ;;  %v570_v44 = vsel %vm535_vm1, %v3750_v7, %v569_v29  ;;  %v3784_v57 = vrot.slane %v3525_v14, 2  ;;  %v579_v4 = vrot.slane %v3536_v26, 2  ;;  %v591_v52 = vrot.slane %v3549_v35, 2 }
  0x44   : > { %v3789_v45 = vrot.slane %v3552_v38, 2  ;;  %v2627_v23 = vpack.i.bf16 %v560_v9, %v3760_v48  ;;  %v594_v6 = vrot.slane %v3563_v51, 2  ;;  %v586_v62 = vrot.slane %v3566_v53, 2 }
  0x45   : > { %2608 = vrot.lane.b32.xlu0 %v2607_v16, %s3279_s29  ;;  %v3779_v16 = vrot.slane %v3509_v61, 2  ;;  %5498 = vst [vmem:[#allocation41_spill] sm:$0xff] %v3784_v57  ;;  %v589_v29 = vrot.slane %v3579_v3, 2  ;;  %v601_v26 = vrot.slane %v3582_v5, 2  ;;  %v602_v20 = vrot.slane %v3595_v19, 2 }
  0x46   : > { %v604_v7 = vrot.slane %v5500_v8, 2  ;;  %v2637_v51 = vpack.i.bf16 %v570_v44, %v3772_v58  ;;  %v3813_v19 = vsel %vm535_vm1, %v576_v18, %v3784_v57  ;;  %v580_v5 = vsel %vm535_vm1, %v3784_v57, %v579_v4  ;;  %v5504_v44 = vld [vmem:[#allocation28_spill] sm:$0xff]  ;;  %v3833_v18 = vld [vmem:[%s3362_s27 + $0xe8] sm:$0x3] }
  0x47   : > { %2623 = vrot.lane.b32.xlu1 %v2622_v2, %s3279_s29  ;;  %v3796_v2 = vrot.slane %v3569_v54, 2  ;;  %v3807_v9 = vsel %vm535_vm1, %v581_v60, %v3779_v16  ;;  %v585_v3 = vsel %vm535_vm1, %v3779_v16, %v584_v59  ;;  %5502 = vst [vmem:[#allocation43_spill] sm:$0xff] %v3813_v19  ;;  %v3819_v8 = vsel %vm535_vm1, %v591_v52, %v3789_v45 }
  0x48   : > { %5501 = vst [vmem:[#allocation25_spill] sm:$0xff] %v3807_v9  ;;  %v596_v60 = vrot.slane %v3608_v28, 2  ;;  %v3830_v59 = vrot.slane %v5504_v44, 2  ;;  %v3838_v52 = vsel %vm535_vm1, %v601_v26, %v602_v20  ;;  %v2652_v44 = vpack.i.bf16 %v585_v3, %v3807_v9  ;;  %v5514_v9 = vld [vmem:[#allocation26_spill] sm:$0xff] }
  0x49   : > { %2618 = vrot.lane.b32.xlu0 %v2617_v37, %s3279_s29  ;;  %5499 = vst [vmem:[#allocation42_spill] sm:$0xff] %v3796_v2  ;;  %v2642_v37 = vpack.i.bf16 %v575_v55, %v3766_v33  ;;  %v3826_v55 = vsel %vm535_vm1, %v586_v62, %v3796_v2  ;;  %v590_v4 = vsel %vm535_vm1, %v3796_v2, %v589_v29  ;;  %v3845_v62 = vld [vmem:[%s3362_s27 + $0x28] sm:$0x3]  ;;  %v3848_v33 = vld [vmem:[%s3362_s27 + $0x100] sm:$0x3]  ;;  %v611_v28 = vrot.slane %v3633_v22, 2 }
  0x4a   : > { %5503 = vst [vmem:[#allocation44_spill] sm:$0xff] %v3826_v55  ;;  %v612_v29 = vrot.slane %v3636_v13, 2  ;;  %v614_v26 = vrot.slane %v3647_v39, 2  ;;  %v2296_v2 = vld [vmem:[%s3362_s27 + $0x40] sm:$0x3]  ;;  %v2657_v22 = vpack.i.bf16 %v590_v4, %v3826_v55  ;;  %v3869_v39 = vsel %vm535_vm1, %v596_v60, %v3830_v59 }
  0x4b   : > { %2633 = vrot.lane.b32.xlu1 %v2632_v41, %s3279_s29  ;;  %v595_v41 = vsel %vm535_vm1, %v3789_v45, %v594_v6  ;;  %v5505_v6 = vld [vmem:[#allocation30_spill] sm:$0xff]  ;;  %v859_v3 = vrot.slane %v3845_v62, 1  ;;  %v3880_v4 = vld [vmem:[%s3362_s27 + $0x100] sm:$0x3] }
  0x4c   : > { %v599_v57 = vrot.slane %v5505_v6, 2  ;;  %5506 = vst [vmem:[#allocation30_spill] sm:$0xff] %v3848_v33  ;;  %v3860_v6 = vpack.i.bf16 %v3368_v1, %v3365_v0  ;;  %v5507_v1 = vld [vmem:[#allocation20_spill] sm:$0xff]  ;;  %v613_v60 = vsel %vm535_vm1, %v611_v28, %v612_v29  ;;  %v5510_v55 = vld [vmem:[#allocation9_spill] sm:$0xff] }
  0x4d   : > { %2628 = vrot.lane.b32.xlu0 %v2627_v23, %s3279_s29  ;;  %v3841_v23 = vsel %vm535_vm1, %v602_v20, %v604_v7  ;;  %v2647_v20 = vpack.i.bf16 %v580_v5, %v3813_v19  ;;  %v2662_v7 = vpack.i.bf16 %v595_v41, %v3819_v8  ;;  %v1355_v41 = vrot.slane %v2296_v2, 1  ;;  %v2251_v28 = vld [vmem:[%s3362_s27 + $0x40] sm:$0x3] }
  0x4e   : > { %v2672_v13 = vpack.i.bf16 %v3841_v23, %v3838_v52  ;;  %v600_v0 = vsel %vm535_vm1, %v3830_v59, %v599_v57  ;;  %v615_v52 = vsel %vm535_vm1, %v612_v29, %v614_v26  ;;  %v3889_v57 = vsel %vm358_vm0, %v5510_v55, %v859_v3  ;;  %v2323_v29 = vld [vmem:[%s3362_s27 + $0x118] sm:$0x3]  ;;  %v5516_v26 = vld [vmem:[#allocation34_spill] sm:$0xff]  ;;  %v5517_v23 = vld [vmem:[#allocation31_spill] sm:$0xff] }
  0x4f   : > { %2643 = vrot.lane.b32.xlu1 %v2642_v37, %s3279_s29  ;;  %v899_v37 = vrot.slane %v3833_v18, 1  ;;  %5511 = vst [vmem:[#allocation9_spill] sm:$0xff] %v3889_v57  ;;  %v609_v19 = vrot.slane %v5516_v26, 2  ;;  %v5518_v3 = vld [vmem:[#allocation5_spill] sm:$0xff]  ;;  %v2682_v21 = vpack.i.bf16 %v615_v52, %v613_v60  ;;  %v864_v55 = vrot.slane %v2251_v28, 1 }
  0x50   : > { %v2299_v52 = vld [vmem:[%s3362_s27 + $0x58] sm:$0x3] }
  0x51   : > { %2638 = vrot.lane.b32.xlu0 %v2637_v51, %s3279_s29  ;;  %v3876_v5 = vsel %vm358_vm0, %v5507_v1, %v899_v37  ;;  %v1395_v51 = vrot.slane %v3848_v33, 1  ;;  %v606_v37 = vrot.slane %v3652_v32, 2  ;;  %v5512_v1 = vld [vmem:[#allocation33_spill] sm:$0xff]  ;;  %v3907_v32 = vsel %vm358_vm0, %v5518_v3, %v1355_v41  ;;  %v5519_v33 = vld [vmem:[#allocation6_spill] sm:$0xff] }
  0x52   : > { %5508 = vst [vmem:[#allocation20_spill] sm:$0xff] %v3876_v5  ;;  %v607_v58 = vrot.slane %v5512_v1, 2  ;;  %v904_v1 = vrot.slane %v3880_v4, 1  ;;  %v1040_v41 = vrot.slane %v2251_v28, 2 }
  0x53   : > { %2653 = vrot.lane.b32.xlu1 %v2652_v44, %s3279_s29  ;;  %v3897_v44 = vsel %vm358_vm0, %v5514_v9, %v1395_v51  ;;  %v2667_v51 = vpack.i.bf16 %v600_v0, %v3869_v39  ;;  %v5522_v0 = vld [vmem:[#allocation24_spill] sm:$0xff] }
  0x54   : > { %5515 = vst [vmem:[#allocation33_spill] sm:$0xff] %v3897_v44  ;;  %v3916_v26 = vsel %vm358_vm0, %v5514_v9, %v904_v1  ;;  %v1400_v44 = vrot.slane %v2323_v29, 1  ;;  %v608_v5 = vsel %vm535_vm1, %v606_v37, %v607_v58  ;;  %v610_v9 = vsel %vm535_vm1, %v607_v58, %v609_v19 }
  0x55   : > { %2648 = vrot.lane.b32.xlu0 %v2647_v20, %s3279_s29  ;;  %v1531_v20 = vrot.slane %v2296_v2, 2  ;;  %v1576_v2 = vrot.slane %v2323_v29, 2  ;;  %v3933_v37 = vsel %vm358_vm0, %v5518_v3, %v864_v55  ;;  %v3937_v1 = vsel %vm535_vm1, %v3709_v46, %v1040_v41 }
  0x56   : > { %5520 = vst [vmem:[#allocation26_spill] sm:$0xff] %v3933_v37  ;;  %5521 = vst [vmem:[#allocation34_spill] sm:$0xff] %v3937_v1  ;;  %v3946_v58 = vsel %vm358_vm0, %v5522_v0, %v1400_v44  ;;  %v1360_v41 = vrot.slane %v2299_v52, 1  ;;  %v2677_v44 = vpack.i.bf16 %v610_v9, %v608_v5  ;;  %v5525_v1 = vld [vmem:[#allocation8_spill] sm:$0xff]  ;;  %v5526_v37 = vld [vmem:[#allocation10_spill] sm:$0xff] }
  0x57   : > { %2663 = vrot.lane.b32.xlu1 %v2662_v7, %s3279_s29  ;;  %v3923_v60 = vsel %vm535_vm1, %v3709_v46, %v1531_v20  ;;  %v2278_v7 = vld [vmem:[%s3362_s27 + $0x118] sm:$0x3]  ;;  %5523 = vst [vmem:[#allocation31_spill] sm:$0xff] %v3946_v58  ;;  %v3950_v19 = vsel %vm535_vm1, %v3789_v45, %v1576_v2  ;;  %v5524_v46 = vld [vmem:[#allocation29_spill] sm:$0xff]  ;;  %v2326_v58 = vld [vmem:[%s3362_s27 + $0x130] sm:$0x3] }
  0x58   : > { %v2254_v20 = vld [vmem:[%s3362_s27 + $0x58] sm:$0x3]  ;;  %v909_v29 = vrot.slane %v2278_v7, 1  ;;  %v1085_v28 = vrot.slane %v2278_v7, 2  ;;  %v3960_v2 = vsel %vm358_vm0, %v5525_v1, %v1360_v41  ;;  %v2257_v7 = vld [vmem:[%s3362_s27 + $0x70] sm:$0x3] }
  0x59   : > { %2658 = vrot.lane.b32.xlu0 %v2657_v22, %s3279_s29  ;;  %v1536_v22 = vrot.slane %v2299_v52, 2  ;;  %v869_v57 = vrot.slane %v2254_v20, 1  ;;  %v1045_v55 = vrot.slane %v2254_v20, 2  ;;  %v2827_v3 = vpack.i.bf16 %v3960_v2, %v5526_v37  ;;  %v5528_v41 = vld [vmem:[#allocation32_spill] sm:$0xff]  ;;  %v5559_v2 = vld [vmem:[#allocation27_spill] sm:$0xff] }
  0x5b   : > { %2673 = vrot.lane.b32.xlu1 %v2672_v13, %s3279_s29  ;;  %v3964_v13 = vsel %vm358_vm0, %v5522_v0, %v909_v29  ;;  %v3973_v5 = vsel %vm535_vm1, %v3704_v47, %v1536_v22  ;;  %v3986_v9 = vsel %vm358_vm0, %v5525_v1, %v869_v57  ;;  %v3990_v20 = vsel %vm535_vm1, %v3704_v47, %v1045_v55  ;;  %v5527_v29 = vld [vmem:[#allocation7_spill] sm:$0xff] }
  0x5c   : > { %v2842_v52 = vpack.i.bf16 %v3964_v13, %v5524_v46  ;;  %v2687_v22 = vpack.i.bf16 %v5527_v29, %v3406_v17  ;;  %v1581_v1 = vrot.slane %v2326_v58, 2  ;;  %v2702_v47 = vpack.i.bf16 %v3446_v36, %v3436_v31  ;;  %v2302_v13 = vld [vmem:[%s3362_s27 + $0x70] sm:$0x3] }
  0x5d   : > { %2668 = vrot.lane.b32.xlu0 %v2667_v51, %s3279_s29  ;;  %v3977_v51 = vsel %vm535_vm1, %v3789_v45, %v1085_v28  ;;  %v1405_v28 = vrot.slane %v2326_v58, 1  ;;  %v4018_v58 = vpack.i.bf16 %v3393_v12, %v3390_v11  ;;  %v874_v29 = vrot.slane %v2257_v7, 1 }
  0x5e   : > { %v4013_v17 = vsel %vm535_vm1, %v3830_v59, %v1581_v1  ;;  %v1050_v31 = vrot.slane %v2257_v7, 2  ;;  %v2712_v55 = vpack.i.bf16 %v3482_v50, %v3479_v49  ;;  %v5529_v1 = vld [vmem:[#allocation13_spill] sm:$0xff]  ;;  %v2707_v49 = vpack.i.bf16 %v3424_v25, %v3421_v24 }
  0x5f   : > { %2683 = vrot.lane.b32.xlu1 %v2682_v21, %s3279_s29  ;;  %v4001_v57 = vsel %vm358_vm0, %v5528_v41, %v1405_v28  ;;  %v2882_v28 = vpack.i.bf16 %v4013_v17, %v3869_v39  ;;  %v4027_v45 = vsel %vm358_vm0, %v5529_v1, %v874_v29  ;;  %v2732_v24 = vpack.i.bf16 %v3569_v54, %v3566_v53  ;;  %v5531_v53 = vld [vmem:[#allocation20_spill] sm:$0xff]  ;;  %v5532_v54 = vld [vmem:[#allocation22_spill] sm:$0xff] }
  0x60   : > { %v4037_v7 = vsel %vm535_vm1, %v3740_v27, %v1050_v31  ;;  %v1075_v25 = vrot.slane %v3833_v18, 2  ;;  %v5533_v18 = vpack.i.bf16 %v5531_v53, %v5532_v54  ;;  %v4089_v31 = vld [vmem:[%s3362_s27 + $0xa0] sm:$0x3]  ;;  %v5537_v1 = vld [vmem:[#allocation38_spill] sm:$0xff] }
  0x61   : > { %2678 = vrot.lane.b32.xlu0 %v2677_v44, %s3279_s29  ;;  %v2281_v44 = vld [vmem:[%s3362_s27 + $0x130] sm:$0x3]  ;;  %s3198_s29 = scalar_lea.vmem %s5334_s23, 256 }
  0x62   : > { %v914_v21 = vrot.slane %v2281_v44, 1  ;;  %v1090_v36 = vrot.slane %v2281_v44, 2  ;;  %v4067_v44 = vld [vmem:[%s3362_s27 + $0x88] sm:$0x3]  ;;  %p3199_p12 = scmp.ne.s32.totalorder %s5334_s23, %s3198_s29 }
  0x63   : > { %2693 = vrot.lane.b32.xlu1 %v3860_v6, %s3280_s30 }
  0x64   : > { %v4033_v0 = vsel %vm358_vm0, %v5528_v41, %v914_v21  ;;  %v2912_v21 = vpack.i.bf16 %v4037_v7, %v3760_v48  ;;  %v2717_v41 = vpack.i.bf16 %v3465_v43, %v3462_v42  ;;  %v1076_v42 = vsel %vm535_vm1, %v3779_v16, %v1075_v25  ;;  %v5534_v16 = vld [vmem:[#allocation25_spill] sm:$0xff]  ;;  %p3200_p13 = pnand %p3199_p12, %p3342_p4 }
  0x65   : > { %2688 = vrot.lane.b32.xlu0 %v2687_v22, %s3280_s30  ;;  %v5530_v22 = vld [vmem:[#allocation15_spill] sm:$0xff]  ;;  %v2897_v50 = vpack.i.bf16 %v4033_v0, %v3668_v63  ;;  %v2737_v43 = vpack.i.bf16 %v3552_v38, %v3549_v35  ;;  %v2752_v29 = vpack.i.bf16 %v1076_v42, %v5534_v16  ;;  %v1060_v35 = vrot.slane %v4089_v31, 2  ;;  %v5542_v42 = vld [vmem:[#allocation40_spill] sm:$0xff]  ;;  %v3167_v0 = vld [vmem:[%s3362_s27 + $0x48] sm:$0xff] }
  0x66   : > { %v2902_v11 = vpack.i.bf16 %v4027_v45, %v5530_v22  ;;  %v5535_v38 = vld [vmem:[#allocation35_spill] sm:$0xff]  ;;  %p3201_p0 = pneg %p3200_p13 }
  0x67   : > { %2703 = vrot.lane.b32.xlu1 %v2702_v47, %s3280_s30  ;;  %v4041_v47 = vsel %vm535_vm1, %v3830_v59, %v1090_v36  ;;  %v2722_v59 = vpack.i.bf16 %v3525_v14, %v3522_v10  ;;  %v1055_v10 = vrot.slane %v4067_v44, 2 }
  0x68   : > { %v2907_v27 = vpack.i.bf16 %v4041_v47, %v3869_v39  ;;  %v3169_v47 = vld [vmem:[%s3362_s27 + $0x78] sm:$0xff] }
  0x69   : > { %2698 = vrot.lane.b32.xlu0 %v4018_v58, %s3280_s30  ;;  %v4078_v14 = vsel %vm535_vm1, %v3713_v40, %v1055_v10 }
  0x6b   : > { %2713 = vrot.lane.b32.xlu1 %v2712_v55, %s3280_s30  ;;  %v2727_v55 = vpack.i.bf16 %v3509_v61, %v3496_v56  ;;  %v1035_v56 = vrot.slane %v3845_v62, 2  ;;  %v5536_v62 = vld [vmem:[#allocation30_spill] sm:$0xff] }
  0x6c   : > { %v1571_v36 = vrot.slane %v5536_v62, 2  ;;  %v5548_v62 = vpack.i.bf16 %v3916_v26, %v5517_v23 }
  0x6d   : > { %2708 = vrot.lane.b32.xlu0 %v2707_v49, %s3280_s30  ;;  %v1036_v40 = vsel %vm535_vm1, %v5535_v38, %v1035_v56  ;;  %v4099_v49 = vsel %vm535_vm1, %v5537_v1, %v1060_v35  ;;  %v5543_v56 = vld [vmem:[#allocation42_spill] sm:$0xff]  ;;  %v1080_v38 = vrot.slane %v3880_v4, 2 }
  0x6e   : > { %v1572_v54 = vsel %vm535_vm1, %v5543_v56, %v1571_v36  ;;  %v5550_v36 = vld [vmem:[#allocation26_spill] sm:$0xff] }
  0x6f   : > { %2723 = vrot.lane.b32.xlu1 %v2722_v59, %s3280_s30  ;;  %v5538_v59 = vld [vmem:[#allocation9_spill] sm:$0xff]  ;;  %v5551_v1 = vpack.i.bf16 %v5550_v36, %v5519_v33  ;;  %v5563_v36 = vpack.i.bf16 %v4001_v57, %v3668_v63 }
  0x71   : > { %2718 = vrot.lane.b32.xlu0 %v2717_v41, %s3280_s30  ;;  %v5539_v41 = vld [vmem:[#allocation11_spill] sm:$0xff] }
  0x72   : > { %v5540_v25 = vpack.i.bf16 %v5538_v59, %v5539_v41 }
  0x73   : > { %2733 = vrot.lane.b32.xlu1 %v2732_v24, %s3280_s30 }
  0x75   : > { %2728 = vrot.lane.b32.xlu0 %v2727_v55, %s3280_s30  ;;  %v5541_v55 = vld [vmem:[#allocation36_spill] sm:$0xff] }
  0x76   : > { %v2757_v10 = vpack.i.bf16 %v1036_v40, %v5541_v55  ;;  %v5547_v40 = vpack.i.bf16 %v3907_v32, %v5519_v33  ;;  %v5552_v32 = vld [vmem:[#allocation34_spill] sm:$0xff] }
  0x77   : > { %2743 = vrot.lane.b32.xlu1 %v5533_v18, %s3281_s3  ;;  %v5544_v18 = vld [vmem:[#allocation33_spill] sm:$0xff] }
  0x78   : > { %v5545_v16 = vpack.i.bf16 %v5544_v18, %v5517_v23  ;;  %v5553_v23 = vpack.i.bf16 %v5552_v32, %v3727_v34  ;;  %v2300_v18 = vld [vmem:[%s3362_s27 + $0x60] sm:$0xff] }
  0x79   : > { %2738 = vrot.lane.b32.xlu0 %v2737_v43, %s3280_s30 }
  0x7b   : > { %2753 = vrot.lane.b32.xlu1 %v2752_v29, %s3282_s4  ;;  %v5546_v29 = vld [vmem:[#allocation44_spill] sm:$0xff] }
  0x7c   : > { %v2782_v35 = vpack.i.bf16 %v1572_v54, %v5546_v29 }
  0x7d   : > { %2748 = vrot.lane.b32.xlu0 %v5540_v25, %s3281_s3 }
  0x7f   : > { %2763 = vrot.lane.b32.xlu1 %v2732_v24, %s3283_s5  ;;  %v1081_v24 = vsel %vm535_vm1, %v5543_v56, %v1080_v38  ;;  %v5560_v56 = vld [vmem:[#allocation28_spill] sm:$0xff] }
  0x80   : > { %v2802_v4 = vpack.i.bf16 %v1081_v24, %v5546_v29  ;;  %v2862_v54 = vpack.i.bf16 %v5560_v56, %v5559_v2  ;;  %v1362_v29 = vrot.slane %v2300_v18, 1  ;;  %v1541_v24 = vrot.slane %v2302_v13, 2 }
  0x81   : > { %2758 = vrot.lane.b32.xlu0 %v2757_v10, %s3282_s4 }
  0x83   : > { %2773 = vrot.lane.b32.xlu1 %v5545_v16, %s3284_s6 }
  0x85   : > { %2768 = vrot.lane.b32.xlu0 %v3860_v6, %s3283_s5  ;;  %v5549_v6 = vpack.i.bf16 %v3923_v60, %v3727_v34  ;;  %v5554_v60 = vld [vmem:[#allocation31_spill] sm:$0xff]  ;;  %v5556_v34 = vpack.i.bf16 %v3950_v19, %v3819_v8 }
  0x86   : > { %v5555_v41 = vpack.i.bf16 %v5554_v60, %v5524_v46  ;;  %v2301_v46 = vld [vmem:[%s3362_s27 + $0x68] sm:$0xff]  ;;  %v4225_v60 = vld [vmem:[%s3362_s27 + $0x78] sm:$0xff] }
  0x87   : > { %2783 = vrot.lane.b32.xlu1 %v2782_v35, %s3285_s7  ;;  %v1363_v16 = vrot.slane %v2301_v46, 1  ;;  %v1365_v35 = vrot.slane %v2302_v13, 1  ;;  %v1543_v13 = vrot.slane %v4225_v60, 2 }
  0x89   : > { %2778 = vrot.lane.b32.xlu0 %v5547_v40, %s3284_s6  ;;  %v2867_v40 = vpack.i.bf16 %v2301_v46, %v2300_v18 }
  0x8b   : > { %2793 = vrot.lane.b32.xlu1 %v5548_v62, %s3281_s3  ;;  %v1364_v62 = vsel %vm358_vm0, %v1362_v29, %v1363_v16 }
  0x8d   : > { %2788 = vrot.lane.b32.xlu0 %v5549_v6, %s3285_s7 }
  0x8f   : > { %2803 = vrot.lane.b32.xlu1 %v2802_v4, %s3282_s4  ;;  %v1366_v4 = vsel %vm358_vm0, %v1363_v16, %v1365_v35 }
  0x91   : > { %2798 = vrot.lane.b32.xlu0 %v5551_v1, %s3281_s3  ;;  %v4219_v1 = vld [vmem:[%s3362_s27 + $0x80] sm:$0xff] }
  0x92   : > { %v1368_v56 = vrot.slane %v4219_v1, 1 }
  0x93   : > { %2813 = vrot.lane.b32.xlu1 %v2737_v43, %s3283_s5 }
  0x95   : > { %2808 = vrot.lane.b32.xlu0 %v5553_v23, %s3282_s4  ;;  %v4146_v26 = vpop.permute.xlu1 %2538  ;;  %v2877_v23 = vpack.i.bf16 %v1366_v4, %v1364_v62 }
  0x97   : > { %v4148_v59 = vpop.permute.xlu0 %2528  ;;  %2823 = vrot.lane.b32.xlu1 %v5555_v41, %s3284_s6  ;;  %v2305_v41 = vld [vmem:[%s3362_s27 + $0x88] sm:$0x3] }
  0x98   : > { %v1546_v17 = vrot.slane %v2305_v41, 2 }
  0x99   : > { %2818 = vrot.lane.b32.xlu0 %v4018_v58, %s3283_s5  ;;  %v4156_v33 = vpop.permute.xlu1 %2543  ;;  %v5557_v58 = vpack.i.bf16 %v3973_v5, %v3721_v15 }
  0x9b   : > { %v4158_v43 = vpop.permute.xlu0 %2533  ;;  %2833 = vrot.lane.b32.xlu1 %v5556_v34, %s3285_s7  ;;  %v2327_v34 = vld [vmem:[%s3362_s27 + $0x138] sm:$0xff] }
  0x9c   : > { %v1407_v35 = vrot.slane %v2327_v34, 1 }
  0x9d   : > { %2828 = vrot.lane.b32.xlu0 %v2827_v3, %s3284_s6  ;;  %v4168_v25 = vpop.permute.xlu1 %2553  ;;  %v5558_v3 = vpack.i.bf16 %v3977_v51, %v3819_v8  ;;  %v1539_v8 = vrot.slane %v2301_v46, 2  ;;  %v1538_v51 = vrot.slane %v2300_v18, 2  ;;  %v1544_v18 = vrot.slane %v4219_v1, 2 }
  0x9e   : > { %v1367_v46 = vrot.slane %v4225_v60, 1  ;;  %v2556_v53 = vunpack.i.h.bf16 %v4168_v25 }
  0x9f   : > { %v4170_v55 = vpop.permute.xlu0 %2548  ;;  %2843 = vrot.lane.b32.xlu1 %v2842_v52, %s3281_s3  ;;  %v5561_v52 = vpack.i.bf16 %v3986_v9, %v5526_v37  ;;  %v5562_v37 = vpack.i.bf16 %v3990_v20, %v3721_v15  ;;  %v1540_v15 = vsel %vm535_vm1, %v1538_v51, %v1539_v8  ;;  %v1542_v20 = vsel %vm535_vm1, %v1539_v8, %v1541_v24 }
  0xa0   : > { %v2887_v57 = vpack.i.bf16 %v1542_v20, %v1540_v15  ;;  %v1583_v51 = vrot.slane %v2327_v34, 2  ;;  %v4249_v62 = vsel %vm358_vm0, %v1367_v46, %v1368_v56  ;;  %v2545_v46 = vunpack.i.l.bf16 %v4156_v33 }
  0xa1   : > { %2838 = vrot.lane.b32.xlu0 %v5557_v58, %s3285_s7  ;;  %v4180_v19 = vpop.permute.xlu1 %2563  ;;  %v2328_v58 = vld [vmem:[%s3362_s27 + $0x140] sm:$0xff]  ;;  %v2550_v48 = vunpack.i.l.bf16 %v4170_v55 }
  0xa2   : > { %v1408_v29 = vrot.slane %v2328_v58, 1 }
  0xa3   : > { %v4182_v10 = vpop.permute.xlu0 %2558  ;;  %2853 = vrot.lane.b32.xlu1 %v5558_v3, %s3282_s4  ;;  %v2329_v3 = vld [vmem:[%s3362_s27 + $0x148] sm:$0x3] }
  0xa4   : > { %v1410_v8 = vrot.slane %v2329_v3, 1  ;;  %v1586_v24 = vrot.slane %v2329_v3, 2  ;;  %v4261_v20 = vsel %vm358_vm0, %v1407_v35, %v1408_v29  ;;  %v4288_v35 = vpack.i.bf16 %v2328_v58, %v2327_v34  ;;  %v4307_v34 = vld [vmem:[%s3362_s27 + $0x150] sm:$0xff] }
  0xa5   : > { %2848 = vrot.lane.b32.xlu0 %v5561_v52, %s3281_s3  ;;  %v4197_v5 = vpop.permute.xlu1 %2573  ;;  %v1370_v52 = vrot.slane %v2305_v41, 1 }
  0xa7   : > { %v4199_v38 = vpop.permute.xlu0 %2568  ;;  %2863 = vrot.lane.b32.xlu1 %v2862_v54, %s3283_s5  ;;  %v4252_v4 = vsel %vm358_vm0, %v1368_v56, %v1370_v52  ;;  %v4286_v52 = vld [vmem:[%s3362_s27 + $0x158] sm:$0xff] }
  0xa9   : > { %2858 = vrot.lane.b32.xlu0 %v5562_v37, %s3282_s4  ;;  %v4206_v9 = vpop.permute.xlu1 %2583  ;;  %v2284_v37 = vld [vmem:[%s3362_s27 + $0x148] sm:$0x3] }
  0xaa   : > { %v919_v41 = vrot.slane %v2284_v37, 1 }
  0xab   : > { %v4210_v6 = vpop.permute.xlu0 %2578  ;;  %2873 = vrot.lane.b32.xlu1 %v5563_v36, %s3284_s6  ;;  %v4255_v36 = vsel %vm535_vm1, %v1543_v13, %v1544_v18 }
  0xad   : > { %2868 = vrot.lane.b32.xlu0 %v2867_v40, %s3283_s5  ;;  %v4222_v32 = vpop.permute.xlu1 %2593 }
  0xaf   : > { %v4231_v2 = vpop.permute.xlu0 %2588  ;;  %2883 = vrot.lane.b32.xlu1 %v2882_v28, %s3285_s7  ;;  %v1584_v28 = vrot.slane %v2328_v58, 2 }
  0xb1   : > { %2878 = vrot.lane.b32.xlu0 %v2877_v23, %s3284_s6  ;;  %v4242_v16 = vpop.permute.xlu1 %2603  ;;  %v4264_v23 = vsel %vm358_vm0, %v1408_v29, %v1410_v8  ;;  %v4270_v3 = vsel %vm535_vm1, %v1583_v51, %v1584_v28  ;;  %v4273_v56 = vsel %vm535_vm1, %v1584_v28, %v1586_v24  ;;  %v4310_v24 = vrot.slane %v4286_v52, 1 }
  0xb2   : > { %v2927_v8 = vpack.i.bf16 %v4264_v23, %v4261_v20  ;;  %v2308_v23 = vld [vmem:[%s3362_s27 + $0xa0] sm:$0x3] }
  0xb3   : > { %v4245_v40 = vpop.permute.xlu0 %2598  ;;  %2893 = vrot.lane.b32.xlu1 %v2862_v54, %s3280_s30  ;;  %v4267_v54 = vsel %vm535_vm1, %v1544_v18, %v1546_v17  ;;  %v2922_v18 = vpack.i.bf16 %v4219_v1, %v4225_v60  ;;  %v1095_v1 = vrot.slane %v2284_v37, 2  ;;  %v879_v60 = vrot.slane %v4067_v44, 1  ;;  %v4325_v44 = vld [vmem:[%s3362_s27 + $0x160] sm:$0x3] }
  0xb5   : > { %2888 = vrot.lane.b32.xlu0 %v2887_v57, %s3285_s7  ;;  %v4258_v15 = vpop.permute.xlu1 %2613  ;;  %v2546_v57 = vunpack.i.h.bf16 %v4156_v33  ;;  %v2932_v33 = vpack.i.bf16 %v4252_v4, %v4249_v62  ;;  %v3175_v62 = vld [vmem:[%s3362_s27 + $0x90] sm:$0xff] }
  0xb7   : > { %v4277_v13 = vpop.permute.xlu0 %2608  ;;  %2903 = vrot.lane.b32.xlu1 %v2902_v11, %s3281_s3  ;;  %v4303_v11 = vsel %vm358_vm0, %v1408_v29, %v919_v41  ;;  %v1712_v63 = vsel %vm1704_vm2, %v3393_v12, %v2546_v57  ;;  %v2555_v29 = vunpack.i.l.bf16 %v4168_v25  ;;  %v4334_v57 = vrot.slane %v4286_v52, 2 }
  0xb8   : > { %v1412_v25 = vrot.slane %v4307_v34, 1 }
  0xb9   : > { %2898 = vrot.lane.b32.xlu0 %v2897_v50, %s3281_s3  ;;  %v2624_v45 = vpop.permute.xlu1 %2623  ;;  %v1711_v50 = vsel %vm1704_vm2, %v3167_v0, %v2545_v46  ;;  %v2551_v46 = vunpack.i.h.bf16 %v4170_v55  ;;  %v1415_v55 = vrot.slane %v4325_v44, 1 }
  0xba   : > { %v2626_v58 = vunpack.i.h.bf16 %v2624_v45  ;;  %v2625_v51 = vunpack.i.l.bf16 %v2624_v45  ;;  %v5565_v45 = vld [vmem:[#allocation12_spill] sm:$0xff] }
  0xbb   : > { %v4318_v37 = vpop.permute.xlu0 %2618  ;;  %2913 = vrot.lane.b32.xlu1 %v2912_v21, %s3282_s4  ;;  %v4344_v21 = vsel %vm535_vm1, %v1584_v28, %v1095_v1  ;;  %v2566_v28 = vunpack.i.h.bf16 %v4180_v19  ;;  %v2565_v1 = vunpack.i.l.bf16 %v4180_v19  ;;  %v3171_v19 = vld [vmem:[%s3362_s27 + $0x60] sm:$0xff] }
  0xbc   : > { %5564 = vst [vmem:[#allocation5_spill] sm:$0xff] %v4318_v37  ;;  %v4328_v41 = vsel %vm1737_vm3, %v1712_v63, %v2626_v58  ;;  %v4331_v12 = vsel %vm1737_vm3, %v1711_v50, %v2625_v51  ;;  %v4348_v58 = vsel %vm358_vm0, %v5565_v45, %v879_v60  ;;  %v3168_v50 = vld [vmem:[%s3362_s27 + $0x80] sm:$0xff]  ;;  %v1713_v0 = vsel %vm1704_vm2, %v3171_v19, %v2550_v48  ;;  %v3172_v48 = vld [vmem:[%s3362_s27 + $0xb0] sm:$0xff] }
  0xbd   : > { %2908 = vrot.lane.b32.xlu0 %v2907_v27, %s3282_s4  ;;  %v2634_v7 = vpop.permute.xlu1 %2633  ;;  %v1716_v39 = vsel %vm1704_vm2, %v3168_v50, %v2556_v53  ;;  %v1715_v27 = vsel %vm1704_vm2, %v3169_v47, %v2555_v29  ;;  %v4366_v50 = vld [vmem:[%s3362_s27 + $0x98] sm:$0xff]  ;;  %v3170_v29 = vld [vmem:[%s3362_s27 + $0x68] sm:$0xff]  ;;  %v1720_v19 = vsel %vm1704_vm2, %v3172_v48, %v2566_v28 }
  0xbe   : > { %v2636_v51 = vunpack.i.h.bf16 %v2634_v7  ;;  %v2635_v63 = vunpack.i.l.bf16 %v2634_v7  ;;  %v1714_v47 = vsel %vm1704_vm2, %v3170_v29, %v2551_v46  ;;  %v4383_v29 = vld [vmem:[%s3362_s27 + $0x90] sm:$0xff] }
  0xbf   : > { %v2629_v60 = vpop.permute.xlu0 %2628  ;;  %2923 = vrot.lane.b32.xlu1 %v2922_v18, %s3283_s5  ;;  %v2561_v18 = vunpack.i.h.bf16 %v4182_v10 }
  0xc0   : > { %v4360_v7 = vsel %vm1737_vm3, %v1716_v39, %v2636_v51  ;;  %v4363_v45 = vsel %vm1737_vm3, %v1715_v27, %v2635_v63  ;;  %v2631_v61 = vunpack.i.h.bf16 %v2629_v60  ;;  %v2630_v53 = vunpack.i.l.bf16 %v2629_v60 }
  0xc1   : > { %v2560_v51 = vunpack.i.l.bf16 %v4182_v10  ;;  %2918 = vrot.lane.b32.xlu0 %v4288_v35, %s3283_s5  ;;  %v2644_v63 = vpop.permute.xlu1 %2643  ;;  %v3173_v10 = vld [vmem:[%s3362_s27 + $0xa8] sm:$0xff] }
  0xc2   : > { %v4377_v39 = vsel %vm1737_vm3, %v1713_v0, %v2630_v53  ;;  %v4380_v27 = vsel %vm1737_vm3, %v1714_v47, %v2631_v61  ;;  %v2646_v60 = vunpack.i.h.bf16 %v2644_v63  ;;  %v2645_v46 = vunpack.i.l.bf16 %v2644_v63  ;;  %v3174_v63 = vld [vmem:[%s3362_s27 + $0x98] sm:$0xff] }
  0xc3   : > { %v1719_v22 = vsel %vm1704_vm2, %v3173_v10, %v2565_v1  ;;  %v2639_v17 = vpop.permute.xlu0 %2638  ;;  %2933 = vrot.lane.b32.xlu1 %v2932_v33, %s3284_s6  ;;  %v4395_v61 = vsel %vm358_vm0, %v1412_v25, %v4310_v24  ;;  %v1373_v0 = vrot.slane %v4366_v50, 1  ;;  %v1718_v48 = vsel %vm1704_vm2, %v3174_v63, %v2561_v18  ;;  %v5567_v63 = vld [vmem:[#allocation14_spill] sm:$0xff] }
  0xc4   : > { %v4399_v53 = vsel %vm1737_vm3, %v1720_v19, %v2646_v60  ;;  %v4402_v28 = vsel %vm1737_vm3, %v1719_v22, %v2645_v46  ;;  %v2641_v1 = vunpack.i.h.bf16 %v2639_v17  ;;  %v2640_v47 = vunpack.i.l.bf16 %v2639_v17 }
  0xc5   : > { %v1717_v4 = vsel %vm1704_vm2, %v3175_v62, %v2560_v51  ;;  %2928 = vrot.lane.b32.xlu0 %v2927_v8, %s3284_s6  ;;  %v4412_v33 = vpop.permute.xlu1 %2653  ;;  %v1549_v25 = vrot.slane %v4366_v50, 2  ;;  %v1372_v22 = vrot.slane %v4383_v29, 1  ;;  %v4424_v18 = vsel %vm358_vm0, %v4310_v24, %v1415_v55 }
  0xc6   : > { %v4417_v60 = vsel %vm1737_vm3, %v1717_v4, %v2640_v47  ;;  %v4420_v17 = vsel %vm1737_vm3, %v1718_v48, %v2641_v1  ;;  %v1548_v51 = vrot.slane %v4383_v29, 2  ;;  %v2586_v8 = vunpack.i.h.bf16 %v4206_v9 }
  0xc7   : > { %v2585_v46 = vunpack.i.l.bf16 %v4206_v9  ;;  %v4430_v19 = vpop.permute.xlu0 %2648  ;;  %v5566_v10 = vpack.i.bf16 %v4267_v54, %v4255_v36  ;;  %v2952_v1 = vpack.i.bf16 %v4303_v11, %v4261_v20  ;;  %v4440_v55 = vpack.i.bf16 %v4286_v52, %v4307_v34 }
  0xc8   : > { %v2962_v47 = vpack.i.bf16 %v4344_v21, %v4270_v3  ;;  %v2957_v9 = vpack.i.bf16 %v4348_v58, %v5567_v63  ;;  %v1591_v36 = vrot.slane %v4325_v44, 2  ;;  %v5568_v20 = vpack.i.bf16 %v4273_v56, %v4270_v3 }
  0xc9   : > { %2943 = vrot.lane.b32.xlu1 %v5566_v10, %s3285_s7  ;;  %v2664_v54 = vpop.permute.xlu1 %2663  ;;  %v5569_v11 = vrot.slane %v4307_v34, 2  ;;  %v4462_v58 = vsel %vm358_vm0, %v1372_v22, %v1373_v0  ;;  %v1375_v44 = vrot.slane %v2308_v23, 1  ;;  %v4465_v3 = vsel %vm535_vm1, %v1548_v51, %v1549_v25  ;;  %v3176_v10 = vld [vmem:[%s3362_s27 + $0x110] sm:$0xff]  ;;  %v4477_v22 = vld [vmem:[%s3362_s27 + $0x160] sm:$0x3] }
  0xca   : > { %2938 = vrot.lane.b32.xlu0 %v5568_v20, %s3285_s7  ;;  %v2666_v62 = vunpack.i.h.bf16 %v2664_v54  ;;  %v2665_v4 = vunpack.i.l.bf16 %v2664_v54  ;;  %v1551_v56 = vrot.slane %v2308_v23, 2  ;;  %v1728_v63 = vsel %vm1704_vm2, %v3176_v10, %v2586_v8  ;;  %v3177_v20 = vld [vmem:[%s3362_s27 + $0x108] sm:$0xff] }
  0xcb   : > { %v4459_v21 = vsel %vm535_vm1, %v5569_v11, %v4334_v57  ;;  %v1727_v34 = vsel %vm1704_vm2, %v3177_v20, %v2585_v46  ;;  %v2596_v48 = vunpack.i.h.bf16 %v4222_v32  ;;  %v2595_v11 = vunpack.i.l.bf16 %v4222_v32  ;;  %v4473_v52 = vpop.permute.xlu0 %2658  ;;  %v3178_v20 = vld [vmem:[%s3362_s27 + $0x140] sm:$0xff] }
  0xcc   : > { %5570 = vst [vmem:[#allocation6_spill] sm:$0xff] %v4473_v52  ;;  %v4480_v51 = vsel %vm1737_vm3, %v1728_v63, %v2666_v62  ;;  %v4483_v23 = vsel %vm1737_vm3, %v1727_v34, %v2665_v4  ;;  %v4487_v8 = vsel %vm535_vm1, %v4334_v57, %v1591_v36  ;;  %v2591_v32 = vunpack.i.h.bf16 %v4231_v2  ;;  %v3179_v34 = vld [vmem:[%s3362_s27 + $0x138] sm:$0xff] }
  0xcd   : > { %2953 = vrot.lane.b32.xlu1 %v2952_v1, %s3281_s3  ;;  %5571 = vst [vmem:[#allocation24_spill] sm:$0xff] %v4480_v51  ;;  %5572 = vst [vmem:[#allocation29_spill] sm:$0xff] %v4483_v23  ;;  %v2590_v46 = vunpack.i.l.bf16 %v4231_v2  ;;  %v2674_v1 = vpop.permute.xlu1 %2673  ;;  %v4494_v54 = vsel %vm358_vm0, %v1373_v0, %v1375_v44  ;;  %v884_v62 = vrot.slane %v4089_v31, 1  ;;  %v4498_v63 = vsel %vm535_vm1, %v1549_v25, %v1551_v56 }
  0xce   : > { %2948 = vrot.lane.b32.xlu0 %v4288_v35, %s3280_s30  ;;  %v2676_v10 = vunpack.i.h.bf16 %v2674_v1  ;;  %v2675_v4 = vunpack.i.l.bf16 %v2674_v1  ;;  %v924_v36 = vrot.slane %v4477_v22, 1  ;;  %v1732_v2 = vsel %vm1704_vm2, %v3178_v20, %v2596_v48  ;;  %v3180_v20 = vld [vmem:[%s3362_s27 + $0x128] sm:$0xff] }
  0xcf   : > { %v1731_v35 = vsel %vm1704_vm2, %v3179_v34, %v2595_v11  ;;  %v2606_v0 = vunpack.i.h.bf16 %v4242_v16  ;;  %v2605_v44 = vunpack.i.l.bf16 %v4242_v16  ;;  %v2669_v31 = vpop.permute.xlu0 %2668  ;;  %v1730_v11 = vsel %vm1704_vm2, %v3180_v20, %v2591_v32  ;;  %v3181_v34 = vld [vmem:[%s3362_s27 + $0x120] sm:$0xff]  ;;  %v3183_v20 = vld [vmem:[%s3362_s27 + $0x168] sm:$0xff] }
  0xd0   : > { %v4509_v1 = vsel %vm1737_vm3, %v1732_v2, %v2676_v10  ;;  %v4512_v25 = vsel %vm1737_vm3, %v1731_v35, %v2675_v4  ;;  %v2671_v56 = vunpack.i.h.bf16 %v2669_v31  ;;  %v2670_v48 = vunpack.i.l.bf16 %v2669_v31  ;;  %v3182_v31 = vld [vmem:[%s3362_s27 + $0x170] sm:$0xff] }
  0xd1   : > { %2963 = vrot.lane.b32.xlu1 %v2962_v47, %s3282_s4  ;;  %5573 = vst [vmem:[#allocation8_spill] sm:$0xff] %v4509_v1  ;;  %5574 = vst [vmem:[#allocation10_spill] sm:$0xff] %v4512_v25  ;;  %v1729_v51 = vsel %vm1704_vm2, %v3181_v34, %v2590_v46  ;;  %v2601_v16 = vunpack.i.h.bf16 %v4245_v40  ;;  %v2600_v47 = vunpack.i.l.bf16 %v4245_v40  ;;  %v2684_v10 = vpop.permute.xlu1 %2683  ;;  %v1736_v46 = vsel %vm1704_vm2, %v3182_v31, %v2606_v0  ;;  %v3184_v31 = vld [vmem:[%s3362_s27 + $0x158] sm:$0xff] }
  0xd2   : > { %2958 = vrot.lane.b32.xlu0 %v2957_v9, %s3281_s3  ;;  %v4522_v2 = vsel %vm1737_vm3, %v1729_v51, %v2670_v48  ;;  %v4525_v4 = vsel %vm1737_vm3, %v1730_v11, %v2671_v56  ;;  %v2686_v35 = vunpack.i.h.bf16 %v2684_v10  ;;  %v2685_v32 = vunpack.i.l.bf16 %v2684_v10  ;;  %v5577_v9 = vld [vmem:[#allocation17_spill] sm:$0xff]  ;;  %v4545_v10 = vld [vmem:[%s3362_s27 + $0xb0] sm:$0xff] }
  0xd3   : > { %5575 = vst [vmem:[#allocation7_spill] sm:$0xff] %v4522_v2  ;;  %5576 = vst [vmem:[#allocation32_spill] sm:$0xff] %v4525_v4  ;;  %v1735_v40 = vsel %vm1704_vm2, %v3183_v20, %v2605_v44  ;;  %v2679_v34 = vpop.permute.xlu0 %2678  ;;  %v4535_v51 = vsel %vm358_vm0, %v5577_v9, %v884_v62  ;;  %v1100_v56 = vrot.slane %v4477_v22, 2  ;;  %v1734_v62 = vsel %vm1704_vm2, %v3184_v31, %v2601_v16  ;;  %v3185_v20 = vld [vmem:[%s3362_s27 + $0x150] sm:$0xff]  ;;  %v2311_v16 = vld [vmem:[%s3362_s27 + $0xb8] sm:$0x3] }
  0xd4   : > { %v4539_v48 = vsel %vm1737_vm3, %v1736_v46, %v2686_v35  ;;  %v4542_v0 = vsel %vm1737_vm3, %v1735_v40, %v2685_v32  ;;  %v2681_v44 = vunpack.i.h.bf16 %v2679_v34  ;;  %v2680_v11 = vunpack.i.l.bf16 %v2679_v34  ;;  %v4562_v40 = vld [vmem:[%s3362_s27 + $0xa8] sm:$0xff]  ;;  %v2334_v34 = vld [vmem:[%s3362_s27 + $0x170] sm:$0xff] }
  0xd5   : > { %2973 = vrot.lane.b32.xlu1 %v4440_v55, %s3283_s5  ;;  %5578 = vst [vmem:[#allocation13_spill] sm:$0xff] %v4539_v48  ;;  %5579 = vst [vmem:[#allocation15_spill] sm:$0xff] %v4542_v0  ;;  %v1733_v9 = vsel %vm1704_vm2, %v3185_v20, %v2600_v47  ;;  %v5580_v22 = vpack.i.bf16 %v4078_v14, %v3733_v30  ;;  %v4555_v35 = vpop.permute.xlu1 %2693  ;;  %v2992_v32 = vpack.i.bf16 %v4487_v8, %v4459_v21  ;;  %v5583_v14 = vld [vmem:[#allocation19_spill] sm:$0xff]  ;;  %v2333_v20 = vld [vmem:[%s3362_s27 + $0x168] sm:$0xff] }
  0xd6   : > { %v2987_v46 = vpack.i.bf16 %v4494_v54, %v4462_v58  ;;  %v4567_v31 = vsel %vm1737_vm3, %v1733_v9, %v2680_v11  ;;  %v4570_v47 = vsel %vm1737_vm3, %v1734_v62, %v2681_v44  ;;  %v2997_v30 = vpack.i.bf16 %v4498_v63, %v4465_v3 }
  0xd7   : > { %2968 = vrot.lane.b32.xlu0 %v5580_v22, %s3282_s4  ;;  %5581 = vst [vmem:[#allocation20_spill] sm:$0xff] %v4567_v31  ;;  %5582 = vst [vmem:[#allocation22_spill] sm:$0xff] %v4570_v47  ;;  %v2335_v22 = vld [vmem:[%s3362_s27 + $0x178] sm:$0x3]  ;;  %v4578_v58 = vpop.permute.xlu0 %2688  ;;  %v5584_v54 = vpack.i.bf16 %v4424_v18, %v4395_v61  ;;  %v4586_v11 = vsel %vm358_vm0, %v4310_v24, %v924_v36  ;;  %v4590_v44 = vsel %vm535_vm1, %v4334_v57, %v1100_v56 }
  0xd8   : > { %v1378_v3 = vrot.slane %v4545_v10, 1  ;;  %v1554_v63 = vrot.slane %v4545_v10, 2  ;;  %v1377_v62 = vrot.slane %v4562_v40, 1  ;;  %v1553_v9 = vrot.slane %v4562_v40, 2  ;;  %v2290_v18 = vld [vmem:[%s3362_s27 + $0x178] sm:$0x3] }
  0xd9   : > { %2983 = vrot.lane.b32.xlu1 %v5584_v54, %s3284_s6  ;;  %v1418_v8 = vrot.slane %v2334_v34, 1  ;;  %v1380_v48 = vrot.slane %v2311_v16, 1  ;;  %v5585_v24 = vpack.i.bf16 %v4366_v50, %v4383_v29  ;;  %v2704_v36 = vpop.permute.xlu1 %2703  ;;  %v1594_v54 = vrot.slane %v2334_v34, 2  ;;  %v4722_v50 = vld [vmem:[%s3362_s27 + $0x190] sm:$0x3] }
  0xda   : > { %v1417_v57 = vrot.slane %v2333_v20, 1  ;;  %v1593_v56 = vrot.slane %v2333_v20, 2  ;;  %v1420_v0 = vrot.slane %v2335_v22, 1  ;;  %v2706_v47 = vunpack.i.h.bf16 %v2704_v36 }
  0xdb   : > { %2978 = vrot.lane.b32.xlu0 %v5585_v24, %s3283_s5  ;;  %v2705_v31 = vunpack.i.l.bf16 %v2704_v36  ;;  %v1556_v1 = vrot.slane %v2311_v16, 2  ;;  %v1596_v25 = vrot.slane %v2335_v22, 2  ;;  %v4601_v4 = vpop.permute.xlu0 %2698  ;;  %v3007_v2 = vpack.i.bf16 %v4586_v11, %v4395_v61 }
  0xdc   : > { %5586 = vst [vmem:[#allocation25_spill] sm:$0xff] %v4601_v4  ;;  %v929_v24 = vrot.slane %v2290_v18, 1  ;;  %v4616_v16 = vsel %vm1770_vm4, %v4328_v41, %v2706_v47  ;;  %v4622_v61 = vsel %vm358_vm0, %v1378_v3, %v1380_v48  ;;  %v4626_v11 = vsel %vm358_vm0, %v1417_v57, %v1418_v8  ;;  %v3188_v4 = vld [vmem:[%s3362_s27 + $0xc8] sm:$0xff] }
  0xdd   : > { %2993 = vrot.lane.b32.xlu1 %v2992_v32, %s3285_s7  ;;  %v4612_v36 = vsel %vm1770_vm4, %v4331_v12, %v2705_v31  ;;  %5588 = vst [vmem:[#allocation30_spill] sm:$0xff] %v4616_v16  ;;  %v4619_v32 = vsel %vm358_vm0, %v1377_v62, %v1378_v3  ;;  %v2714_v22 = vpop.permute.xlu1 %2713  ;;  %v4629_v29 = vsel %vm358_vm0, %v1418_v8, %v1420_v0  ;;  %v2266_v3 = vld [vmem:[%s3362_s27 + $0xb8] sm:$0x3] }
  0xde   : > { %5587 = vst [vmem:[#allocation35_spill] sm:$0xff] %v4612_v36  ;;  %v4632_v12 = vsel %vm535_vm1, %v1553_v9, %v1554_v63  ;;  %v4635_v41 = vsel %vm535_vm1, %v1593_v56, %v1594_v54  ;;  %v2716_v31 = vunpack.i.h.bf16 %v2714_v22  ;;  %v2715_v47 = vunpack.i.l.bf16 %v2714_v22  ;;  %v2269_v9 = vld [vmem:[%s3362_s27 + $0xd0] sm:$0x3] }
  0xdf   : > { %2988 = vrot.lane.b32.xlu0 %v2987_v46, %s3284_s6  ;;  %v4638_v48 = vsel %vm535_vm1, %v1554_v63, %v1556_v1  ;;  %v4641_v46 = vsel %vm535_vm1, %v1594_v54, %v1596_v25  ;;  %v2709_v62 = vpop.permute.xlu0 %2708  ;;  %v4646_v0 = vpack.i.bf16 %v2334_v34, %v2333_v20  ;;  %v4651_v57 = vsel %vm358_vm0, %v1418_v8, %v929_v24  ;;  %v4697_v63 = vld [vmem:[%s3362_s27 + $0xc8] sm:$0xff] }
  0xe0   : > { %v1105_v56 = vrot.slane %v2290_v18, 2  ;;  %v4655_v1 = vsel %vm1770_vm4, %v4363_v45, %v2715_v47  ;;  %v4659_v25 = vsel %vm1770_vm4, %v4360_v7, %v2716_v31  ;;  %v2710_v34 = vunpack.i.l.bf16 %v2709_v62  ;;  %v2336_v31 = vld [vmem:[%s3362_s27 + $0x180] sm:$0xff]  ;;  %v2337_v47 = vld [vmem:[%s3362_s27 + $0x188] sm:$0xff] }
  0xe1   : > { %3003 = vrot.lane.b32.xlu1 %v4440_v55, %s3280_s30  ;;  %5589 = vst [vmem:[#allocation38_spill] sm:$0xff] %v4655_v1  ;;  %5590 = vst [vmem:[#allocation9_spill] sm:$0xff] %v4659_v25  ;;  %v2711_v55 = vunpack.i.h.bf16 %v2709_v62  ;;  %v2724_v20 = vpop.permute.xlu1 %2723  ;;  %v889_v45 = vrot.slane %v2266_v3, 1  ;;  %v5593_v18 = vpack.i.bf16 %v4535_v51, %v5583_v14  ;;  %v1598_v8 = vrot.slane %v2336_v31, 2 }
  0xe2   : > { %v4670_v7 = vsel %vm1770_vm4, %v4377_v39, %v2710_v34  ;;  %v2726_v24 = vunpack.i.h.bf16 %v2724_v20  ;;  %v2725_v22 = vunpack.i.l.bf16 %v2724_v20  ;;  %v4685_v34 = vsel %vm535_vm1, %v1594_v54, %v1105_v56  ;;  %v2314_v39 = vld [vmem:[%s3362_s27 + $0xd0] sm:$0x3] }
  0xe3   : > { %2998 = vrot.lane.b32.xlu0 %v2997_v30, %s3285_s7  ;;  %5591 = vst [vmem:[#allocation11_spill] sm:$0xff] %v4670_v7  ;;  %v4674_v30 = vsel %vm1770_vm4, %v4380_v27, %v2711_v55  ;;  %v2719_v62 = vpop.permute.xlu0 %2718  ;;  %v1065_v27 = vrot.slane %v2266_v3, 2  ;;  %v5596_v3 = vld [vmem:[#allocation16_spill] sm:$0xff]  ;;  %v1385_v25 = vrot.slane %v2314_v39, 1  ;;  %v934_v1 = vrot.slane %v4722_v50, 1 }
  0xe4   : > { %5592 = vst [vmem:[#allocation36_spill] sm:$0xff] %v4674_v30  ;;  %v4689_v55 = vsel %vm1770_vm4, %v4402_v28, %v2725_v22  ;;  %v4693_v20 = vsel %vm1770_vm4, %v4399_v53, %v2726_v24  ;;  %v2721_v51 = vunpack.i.h.bf16 %v2719_v62  ;;  %v2720_v14 = vunpack.i.l.bf16 %v2719_v62  ;;  %v4709_v24 = vld [vmem:[%s3362_s27 + $0xc0] sm:$0xff]  ;;  %v5602_v30 = vld [vmem:[#allocation18_spill] sm:$0xff] }
  0xe5   : > { %3013 = vrot.lane.b32.xlu1 %v5593_v18, %s3281_s3  ;;  %5594 = vst [vmem:[#allocation40_spill] sm:$0xff] %v4689_v55  ;;  %5595 = vst [vmem:[#allocation42_spill] sm:$0xff] %v4693_v20  ;;  %v2338_v18 = vld [vmem:[%s3362_s27 + $0x190] sm:$0x3]  ;;  %v4700_v54 = vpop.permute.xlu1 %2733  ;;  %v4704_v56 = vsel %vm358_vm0, %v5596_v3, %v889_v45  ;;  %v1423_v28 = vrot.slane %v2337_v47, 1  ;;  %v4706_v22 = vrot.slane %v2337_v47, 2  ;;  %v5599_v3 = vpack.i.bf16 %v4099_v49, %v5542_v42 }
  0xe6   : > { %v1422_v53 = vrot.slane %v2336_v31, 1  ;;  %v4714_v62 = vsel %vm1770_vm4, %v4417_v60, %v2720_v14  ;;  %v5600_v20 = vld [vmem:[#allocation37_spill] sm:$0xff]  ;;  %v1425_v60 = vrot.slane %v2338_v18, 1  ;;  %v1383_v14 = vrot.slane %v4697_v63, 1 }
  0xe7   : > { %3008 = vrot.lane.b32.xlu0 %v3007_v2, %s3281_s3  ;;  %5597 = vst [vmem:[#allocation33_spill] sm:$0xff] %v4714_v62  ;;  %v4718_v2 = vsel %vm1770_vm4, %v4420_v17, %v2721_v51  ;;  %v4724_v45 = vpop.permute.xlu0 %2728  ;;  %v4732_v55 = vsel %vm535_vm1, %v5600_v20, %v1065_v27  ;;  %v1559_v17 = vrot.slane %v4697_v63, 2  ;;  %v1382_v51 = vrot.slane %v4709_v24, 1 }
  0xe8   : > { %5598 = vst [vmem:[#allocation44_spill] sm:$0xff] %v4718_v2  ;;  %v1558_v2 = vrot.slane %v4709_v24, 2  ;;  %v1601_v62 = vrot.slane %v2338_v18, 2  ;;  %v5601_v49 = vpack.i.bf16 %v4590_v44, %v4459_v21  ;;  %v1561_v20 = vrot.slane %v2314_v39, 2  ;;  %v5605_v39 = vld [vmem:[#allocation39_spill] sm:$0xff] }
  0xe9   : > { %3023 = vrot.lane.b32.xlu1 %v5599_v3, %s3282_s4  ;;  %v4742_v42 = vpop.permute.xlu1 %2743  ;;  %v894_v3 = vrot.slane %v2269_v9, 1  ;;  %v4749_v16 = vpack.i.bf16 %v2337_v47, %v2336_v31  ;;  %v4752_v18 = vsel %vm358_vm0, %v1422_v53, %v1423_v28  ;;  %v1070_v36 = vrot.slane %v2269_v9, 2 }
  0xea   : > { %v5604_v44 = vpack.i.bf16 %v4545_v10, %v4562_v40  ;;  %v4763_v27 = vsel %vm358_vm0, %v1423_v28, %v1425_v60  ;;  %v4769_v47 = vsel %vm535_vm1, %v1598_v8, %v4706_v22  ;;  %v4773_v9 = vsel %vm535_vm1, %v4706_v22, %v1601_v62  ;;  %v5606_v62 = vld [vmem:[#allocation21_spill] sm:$0xff] }
  0xeb   : > { %3018 = vrot.lane.b32.xlu0 %v5601_v49, %s3282_s4  ;;  %v4754_v21 = vpop.permute.xlu0 %2738  ;;  %v4776_v10 = vsel %vm358_vm0, %v1382_v51, %v1383_v14  ;;  %v4779_v40 = vsel %vm358_vm0, %v1383_v14, %v1385_v25  ;;  %v4782_v53 = vsel %vm535_vm1, %v1558_v2, %v1559_v17  ;;  %v4789_v8 = vsel %vm535_vm1, %v1559_v17, %v1561_v20  ;;  %v5607_v2 = vld [vmem:[#allocation41_spill] sm:$0xff] }
  0xec   : > { %5603 = vst [vmem:[#allocation26_spill] sm:$0xff] %v4754_v21  ;;  %v4796_v51 = vsel %vm358_vm0, %v1423_v28, %v934_v1  ;;  %v2531_v25 = vunpack.i.h.bf16 %v4148_v59  ;;  %v4801_v14 = vsel %vm535_vm1, %v5607_v2, %v1070_v36  ;;  %v1110_v31 = vrot.slane %v4722_v50, 2  ;;  %v3186_v36 = vld [vmem:[%s3362_s27 + $0x8] sm:$0xff] }
  0xed   : > { %3033 = vrot.lane.b32.xlu1 %v5604_v44, %s3283_s5  ;;  %v4786_v60 = vpop.permute.xlu1 %2753  ;;  %v4793_v44 = vsel %vm358_vm0, %v5606_v62, %v894_v3  ;;  %v2530_v49 = vunpack.i.l.bf16 %v4148_v59  ;;  %v2571_v17 = vunpack.i.h.bf16 %v4199_v38  ;;  %v5608_v1 = vpack.i.bf16 %v4622_v61, %v4619_v32  ;;  %v5609_v32 = vld [vmem:[#allocation23_spill] sm:$0xff] }
  0xee   : > { %v2570_v50 = vunpack.i.l.bf16 %v4199_v38  ;;  %v2611_v62 = vunpack.i.h.bf16 %v4277_v13  ;;  %v2610_v2 = vunpack.i.l.bf16 %v4277_v13  ;;  %v5610_v38 = vpack.i.bf16 %v4629_v29, %v4626_v11  ;;  %v5611_v59 = vld [vmem:[#allocation43_spill] sm:$0xff] }
  0xef   : > { %3028 = vrot.lane.b32.xlu0 %v4646_v0, %s3283_s5  ;;  %v4806_v20 = vpop.permute.xlu0 %2748  ;;  %v1706_v28 = vsel %vm1704_vm2, %v3186_v36, %v2531_v25  ;;  %v2651_v13 = vunpack.i.h.bf16 %v4430_v19  ;;  %v2650_v7 = vunpack.i.l.bf16 %v4430_v19  ;;  %v4839_v29 = vsel %vm535_vm1, %v4706_v22, %v1110_v31  ;;  %v3189_v25 = vld [vmem:[%s3362_s27 + $0xc0] sm:$0xff] }
  0xf0   : > { %v1722_v3 = vsel %vm1704_vm2, %v3188_v4, %v2571_v17  ;;  %v2731_v21 = vunpack.i.h.bf16 %v4724_v45  ;;  %v2730_v61 = vunpack.i.l.bf16 %v4724_v45  ;;  %v5612_v19 = vpack.i.bf16 %v4638_v48, %v4632_v12 }
  0xf1   : > { %3043 = vrot.lane.b32.xlu1 %v5608_v1, %s3284_s6  ;;  %v2764_v1 = vpop.permute.xlu1 %2763  ;;  %v1721_v22 = vsel %vm1704_vm2, %v3189_v25, %v2570_v50  ;;  %v2690_v31 = vunpack.i.l.bf16 %v4578_v58  ;;  %v2745_v4 = vunpack.i.l.bf16 %v4742_v42  ;;  %v1739_v45 = vsel %vm1737_vm3, %v1706_v28, %v2611_v62 }
  0xf2   : > { %v2756_v36 = vunpack.i.h.bf16 %v4786_v60  ;;  %v5613_v12 = vpack.i.bf16 %v4641_v46, %v4635_v41  ;;  %v1754_v50 = vsel %vm1737_vm3, %v1721_v22, %v2650_v7  ;;  %v2766_v25 = vunpack.i.h.bf16 %v2764_v1 }
  0xf3   : > { %3038 = vrot.lane.b32.xlu0 %v5610_v38, %s3284_s6  ;;  %v3187_v38 = vld [vmem:[%s3362_s27] sm:$0xff]  ;;  %v4847_v52 = vpop.permute.xlu0 %2758  ;;  %v2691_v46 = vunpack.i.h.bf16 %v4578_v58  ;;  %v2750_v22 = vunpack.i.l.bf16 %v4806_v20 }
  0xf4   : > { %v1705_v23 = vsel %vm1704_vm2, %v3187_v38, %v2530_v49  ;;  %v2746_v49 = vunpack.i.h.bf16 %v4742_v42  ;;  %v2755_v38 = vunpack.i.l.bf16 %v4786_v60  ;;  %v2765_v42 = vunpack.i.l.bf16 %v2764_v1 }
  0xf5   : > { %3053 = vrot.lane.b32.xlu1 %v5612_v19, %s3285_s7  ;;  %v1738_v17 = vsel %vm1737_vm3, %v1705_v23, %v2610_v2  ;;  %v2774_v48 = vpop.permute.xlu1 %2773  ;;  %v1755_v19 = vsel %vm1737_vm3, %v1722_v3, %v2651_v13  ;;  %v1787_v23 = vsel %vm1770_vm4, %v1754_v50, %v2730_v61  ;;  %v5614_v60 = vpack.i.bf16 %v4651_v57, %v4626_v11 }
  0xf6   : > { %v1788_v28 = vsel %vm1770_vm4, %v1755_v19, %v2731_v21  ;;  %v2776_v62 = vunpack.i.h.bf16 %v2774_v48  ;;  %v2775_v2 = vunpack.i.l.bf16 %v2774_v48  ;;  %v1771_v7 = vsel %vm1770_vm4, %v1738_v17, %v2690_v31 }
  0xf7   : > { %3048 = vrot.lane.b32.xlu0 %v5613_v12, %s3285_s7  ;;  %v2769_v37 = vpop.permute.xlu0 %2768  ;;  %v1820_v3 = vsel %vm1803_vm5, %v1787_v23, %v2745_v4  ;;  %v1821_v1 = vsel %vm1803_vm5, %v1788_v28, %v2746_v49  ;;  %v2751_v13 = vunpack.i.h.bf16 %v4806_v20  ;;  %v2761_v4 = vunpack.i.h.bf16 %v4847_v52 }
  0xf8   : > { %v1853_v61 = vsel %vm1836_vm6, %v1820_v3, %v2755_v38  ;;  %v1854_v21 = vsel %vm1836_vm6, %v1821_v1, %v2756_v36  ;;  %v2760_v17 = vunpack.i.l.bf16 %v4847_v52  ;;  %v5615_v20 = vpack.i.bf16 %v4685_v34, %v4635_v41  ;;  %v4906_v41 = vld [vmem:[%s3362_s27 + $0xe0] sm:$0xff] }
  0xf9   : > { %3063 = vrot.lane.b32.xlu1 %v5614_v60, %s3281_s3  ;;  %v2784_v11 = vpop.permute.xlu1 %2783  ;;  %v1886_v58 = vsel %vm1869_vm7, %v1853_v61, %v2765_v42  ;;  %v1887_v57 = vsel %vm1869_vm7, %v1854_v21, %v2766_v25  ;;  %v2771_v12 = vunpack.i.h.bf16 %v2769_v37  ;;  %v2770_v48 = vunpack.i.l.bf16 %v2769_v37  ;;  %v4903_v25 = vld [vmem:[%s3362_s27 + $0xd8] sm:$0xff] }
  0xfa   : > { %v2786_v31 = vunpack.i.h.bf16 %v2784_v11  ;;  %v2785_v49 = vunpack.i.l.bf16 %v2784_v11  ;;  %v1920_v38 = vsel %vm1902_vm8, %v1887_v57, %v2776_v62  ;;  %v1772_v34 = vsel %vm1770_vm4, %v1739_v45, %v2691_v46 }
  0xfb   : > { %3058 = vrot.lane.b32.xlu0 %v4646_v0, %s3280_s30  ;;  %v2779_v36 = vpop.permute.xlu0 %2778  ;;  %v1919_v0 = vsel %vm1902_vm8, %v1886_v58, %v2775_v2  ;;  %v5618_v37 = vpack.i.bf16 %v4704_v56, %v5602_v30  ;;  %v2541_v2 = vunpack.i.h.bf16 %v4146_v26  ;;  %v1804_v60 = vsel %vm1803_vm5, %v1771_v7, %v2750_v22  ;;  %v4930_v7 = vld [vmem:[%s3362_s27 + $0x1a0] sm:$0xff] }
  0xfc   : > { %v1952_v50 = vsel %vm1935_vm9, %v1919_v0, %v2785_v49  ;;  %v1953_v19 = vsel %vm1935_vm9, %v1920_v38, %v2786_v31  ;;  %v2781_v42 = vunpack.i.h.bf16 %v2779_v36  ;;  %v2780_v23 = vunpack.i.l.bf16 %v2779_v36  ;;  %v4945_v36 = vld [vmem:[%s3362_s27 + $0x198] sm:$0xff] }
  0xfd   : > { %3073 = vrot.lane.b32.xlu1 %v5615_v20, %s3282_s4  ;;  %v4913_v28 = vpop.permute.xlu1 %2793  ;;  %v2415_v62 = vpack.c.bf16 %v1953_v19, %v1952_v50  ;;  %v1805_v3 = vsel %vm1803_vm5, %v1772_v34, %v2751_v13  ;;  %v3127_v45 = vpack.i.bf16 %v4839_v29, %v4769_v47  ;;  %v2540_v46 = vunpack.i.l.bf16 %v4146_v26 }
  0xfe   : > { %v1837_v1 = vsel %vm1836_vm6, %v1804_v60, %v2760_v17  ;;  %v1838_v61 = vsel %vm1836_vm6, %v1805_v3, %v2761_v4  ;;  %v3142_v56 = vpack.i.bf16 %v4906_v41, %v4903_v25  ;;  %v5619_v31 = vpack.i.bf16 %v4732_v55, %v5605_v39 }
  0xff   : > { %3068 = vrot.lane.b32.xlu0 %v5618_v37, %s3281_s3  ;;  %v2789_v30 = vpop.permute.xlu0 %2788  ;;  %2417 = vmatprep.subr.msk.bf16.mxu0 %vm4898_vm11, %v2415_v62  ;;  %v1870_v21 = vsel %vm1869_vm7, %v1837_v1, %v2770_v48  ;;  %v1871_v13 = vsel %vm1869_vm7, %v1838_v61, %v2771_v12  ;;  %v1388_v4 = vrot.slane %v4906_v41, 1  ;;  %v1387_v17 = vrot.slane %v4903_v25, 1 }
 0x100   : > { %v2791_v22 = vunpack.i.h.bf16 %v2789_v30  ;;  %v2790_v11 = vunpack.i.l.bf16 %v2789_v30  ;;  %v1903_v58 = vsel %vm1902_vm8, %v1870_v21, %v2780_v23  ;;  %v1904_v57 = vsel %vm1902_vm8, %v1871_v13, %v2781_v42  ;;  %v4961_v42 = vld [vmem:[%s3362_s27 + $0xe8] sm:$0x3]  ;;  %v3190_v30 = vld [vmem:[%s3362_s27 + $0x20] sm:$0xff]  ;;  %v3191_v13 = vld [vmem:[%s3362_s27 + $0x18] sm:$0xff] }
 0x101   : > { %3083 = vrot.lane.b32.xlu1 %v4749_v16, %s3283_s5  ;;  %v4940_v49 = vpop.permute.xlu1 %2803  ;;  %v2536_v20 = vunpack.i.h.bf16 %v4158_v43  ;;  %v1428_v12 = vrot.slane %v4930_v7, 1  ;;  %v2535_v55 = vunpack.i.l.bf16 %v4158_v43  ;;  %v2576_v39 = vunpack.i.h.bf16 %v4197_v5 }
 0x102   : > { %v1936_v0 = vsel %vm1935_vm9, %v1903_v58, %v2790_v11  ;;  %v1937_v38 = vsel %vm1935_vm9, %v1904_v57, %v2791_v22  ;;  %v5620_v50 = vpack.i.bf16 %v4763_v27, %v4752_v18  ;;  %v1564_v34 = vrot.slane %v4906_v41, 2  ;;  %v3192_v11 = vld [vmem:[%s3362_s27 + $0xe0] sm:$0xff] }
 0x103   : > { %3078 = vrot.lane.b32.xlu0 %v5619_v31, %s3282_s4  ;;  %v4953_v48 = vpop.permute.xlu0 %2798  ;;  %v2418_v19 = vpack.c.bf16 %v1937_v38, %v1936_v0  ;;  %v2575_v23 = vunpack.i.l.bf16 %v4197_v5  ;;  %v1563_v43 = vrot.slane %v4903_v25, 2  ;;  %v1604_v37 = vrot.slane %v4930_v7, 2  ;;  %v3193_v0 = vld [vmem:[%s3362_s27 + $0xd8] sm:$0xff] }
 0x104   : > { %v1427_v62 = vrot.slane %v4945_v36, 1  ;;  %v2616_v60 = vunpack.i.h.bf16 %v4258_v15  ;;  %v2615_v27 = vunpack.i.l.bf16 %v4258_v15  ;;  %v5621_v3 = vpack.i.bf16 %v4697_v63, %v4709_v24 }
 0x105   : > { %3093 = vrot.lane.b32.xlu1 %v5620_v50, %s3284_s6  ;;  %2420 = vmatpush3.bf16.xpose.msk.msra.mxu0 %vm4898_vm11, %v2418_v19  ;;  %v2814_v5 = vpop.permute.xlu1 %2813  ;;  %v1603_v1 = vrot.slane %v4945_v36, 2  ;;  %v4979_v61 = vsel %vm358_vm0, %v1387_v17, %v1388_v4  ;;  %v1708_v15 = vsel %vm1704_vm2, %v3190_v30, %v2536_v20  ;;  %v2656_v21 = vunpack.i.h.bf16 %v4412_v33 }
 0x106   : > { %v2655_v63 = vunpack.i.l.bf16 %v4412_v33  ;;  %v1390_v24 = vrot.slane %v4961_v42, 1  ;;  %v1707_v22 = vsel %vm1704_vm2, %v3191_v13, %v2535_v55  ;;  %v1724_v58 = vsel %vm1704_vm2, %v3192_v11, %v2576_v39 }
 0x107   : > { %3088 = vrot.lane.b32.xlu0 %v5621_v3, %s3283_s5  ;;  %v2736_v57 = vunpack.i.h.bf16 %v4700_v54  ;;  %v2735_v31 = vunpack.i.l.bf16 %v4700_v54  ;;  %v2809_v17 = vpop.permute.xlu0 %2808  ;;  %v5622_v20 = vpack.i.bf16 %v4773_v9, %v4769_v47  ;;  %v1723_v33 = vsel %vm1704_vm2, %v3193_v0, %v2575_v23 }
 0x108   : > { %v2695_v38 = vunpack.i.l.bf16 %v4555_v35  ;;  %v2796_v55 = vunpack.i.h.bf16 %v4913_v28  ;;  %v2795_v50 = vunpack.i.l.bf16 %v4913_v28  ;;  %v1740_v39 = vsel %vm1737_vm3, %v1707_v22, %v2615_v27 }
 0x109   : > { %3103 = vrot.lane.b32.xlu1 %v5622_v20, %s3285_s7  ;;  %v1741_v19 = vsel %vm1737_vm3, %v1708_v15, %v2616_v60  ;;  %v2806_v54 = vunpack.i.h.bf16 %v4940_v49  ;;  %v2805_v3 = vunpack.i.l.bf16 %v4940_v49  ;;  %v5623_v9 = vpack.i.bf16 %v4779_v40, %v4776_v10  ;;  %v2824_v23 = vpop.permute.xlu1 %2823 }
 0x10a   : > { %v1757_v30 = vsel %vm1737_vm3, %v1724_v58, %v2656_v21  ;;  %v1756_v13 = vsel %vm1737_vm3, %v1723_v33, %v2655_v63  ;;  %v2816_v11 = vunpack.i.h.bf16 %v2814_v5  ;;  %v2815_v28 = vunpack.i.l.bf16 %v2814_v5 }
 0x10b   : > { %3098 = vrot.lane.b32.xlu0 %v5623_v9, %s3284_s6  ;;  %v1789_v27 = vsel %vm1770_vm4, %v1756_v13, %v2735_v31  ;;  %v1790_v60 = vsel %vm1770_vm4, %v1757_v30, %v2736_v57  ;;  %v2826_v15 = vunpack.i.h.bf16 %v2824_v23  ;;  %v2825_v22 = vunpack.i.l.bf16 %v2824_v23  ;;  %v2819_v20 = vpop.permute.xlu0 %2818 }
 0x10c   : > { %v2696_v10 = vunpack.i.h.bf16 %v4555_v35  ;;  %v1773_v40 = vsel %vm1770_vm4, %v1740_v39, %v2695_v38  ;;  %v1822_v49 = vsel %vm1803_vm5, %v1789_v27, %v2795_v50  ;;  %v1823_v21 = vsel %vm1803_vm5, %v1790_v60, %v2796_v55 }
 0x10d   : > { %3113 = vrot.lane.b32.xlu1 %v4749_v16, %s3280_s30  ;;  %v1855_v5 = vsel %vm1836_vm6, %v1822_v49, %v2805_v3  ;;  %v1856_v63 = vsel %vm1836_vm6, %v1823_v21, %v2806_v54  ;;  %v2801_v58 = vunpack.i.h.bf16 %v4953_v48  ;;  %v2800_v57 = vunpack.i.l.bf16 %v4953_v48  ;;  %v2834_v35 = vpop.permute.xlu1 %2833  ;;  %s3202_s30 = sshll.u32 %s3286_s12, 4  ;;  %s3203_s30 = int_to_ptr.vmem [resolvable:$false] %s3202_s30 }
 0x10e   : > { %v5624_v16 = vpack.i.bf16 %v4789_v8, %v4782_v53  ;;  %v1888_v31 = vsel %vm1869_vm7, %v1855_v5, %v2815_v28  ;;  %v1889_v0 = vsel %vm1869_vm7, %v1856_v63, %v2816_v11  ;;  %v2836_v33 = vunpack.i.h.bf16 %v2834_v35  ;;  %v2341_v53 = vld [vmem:[%s3362_s27 + $0x1a8] sm:$0x3]  ;;  %p3205_p1 = scmp.lt.s32.totalorder %s5334_s23, %s3203_s30 }
 0x10f   : > { %v2835_v38 = vunpack.i.l.bf16 %v2834_v35  ;;  %v2811_v55 = vunpack.i.h.bf16 %v2809_v17  ;;  %v2810_v50 = vunpack.i.l.bf16 %v2809_v17  ;;  %v1921_v39 = vsel %vm1902_vm8, %v1888_v31, %v2825_v22  ;;  %v2829_v3 = vpop.permute.xlu0 %2828 }
 0x110   : > { %3108 = vrot.lane.b32.xlu0 %v5624_v16, %s3285_s7  ;;  %v1922_v54 = vsel %vm1902_vm8, %v1889_v0, %v2826_v15  ;;  %v5625_v48 = vpack.i.bf16 %v4793_v44, %v5609_v32  ;;  %v2821_v8 = vunpack.i.h.bf16 %v2819_v20  ;;  %v2820_v9 = vunpack.i.l.bf16 %v2819_v20  ;;  %v5629_v0 = vld [vmem:[#allocation6_spill] sm:$0xff] }
 0x111   : > { %v1954_v23 = vsel %vm1935_vm9, %v1921_v39, %v2835_v38  ;;  %v1955_v30 = vsel %vm1935_vm9, %v1922_v54, %v2836_v33  ;;  %v1774_v13 = vsel %vm1770_vm4, %v1741_v19, %v2696_v10  ;;  %v2831_v11 = vunpack.i.h.bf16 %v2829_v3  ;;  %v5043_v60 = vpop.permute.xlu1 %2843  ;;  %v5630_v54 = vld [vmem:[#allocation26_spill] sm:$0xff] }
 0x112   : > { %3123 = vrot.lane.b32.xlu1 %v5625_v48, %s3281_s3  ;;  %v2421_v17 = vpack.c.bf16 %v1955_v30, %v1954_v23  ;;  %v2830_v28 = vunpack.i.l.bf16 %v2829_v3  ;;  %v5626_v27 = vpack.i.bf16 %v4796_v51, %v4752_v18  ;;  %v1806_v44 = vsel %vm1803_vm5, %v1773_v40, %v2800_v57 }
 0x113   : > { %v1807_v32 = vsel %vm1803_vm5, %v1774_v13, %v2801_v58  ;;  %v1391_v19 = vsel %vm358_vm0, %v1388_v4, %v1390_v24  ;;  %v1430_v15 = vrot.slane %v2341_v53, 1  ;;  %v1839_v22 = vsel %vm1836_vm6, %v1806_v44, %v2810_v50  ;;  %v2839_v10 = vpop.permute.xlu0 %2838  ;;  %v3196_v50 = vld [vmem:[%s3362_s27 + $0xf8] sm:$0xff] }
 0x114   : > { %3118 = vrot.lane.b32.xlu0 %v5626_v27, %s3281_s3  ;;  %v1840_v20 = vsel %vm1836_vm6, %v1807_v32, %v2811_v55  ;;  %v5627_v18 = vpack.i.bf16 %v4801_v14, %v5611_v59  ;;  %2423 = vmatprep.subr.msk.bf16.mxu0 %vm4898_vm11, %v2421_v17  ;;  %v1566_v51 = vrot.slane %v4961_v42, 2  ;;  %v1606_v40 = vrot.slane %v2341_v53, 2  ;;  %v5126_v55 = vld [vmem:[%s5385_s1] sm:$0xff]  ;;  %v3197_v53 = vld [vmem:[%s3362_s27 + $0xf0] sm:$0xff]  ;;  %s3204_s3 = scalar_lea.vmem %s3203_s30, 512 }
 0x115   : > { %v1872_v49 = vsel %vm1869_vm7, %v1839_v22, %v2820_v9  ;;  %v1873_v4 = vsel %vm1869_vm7, %v1840_v20, %v2821_v8  ;;  %v2841_v24 = vunpack.i.h.bf16 %v2839_v10  ;;  %v2840_v21 = vunpack.i.l.bf16 %v2839_v10  ;;  %v5069_v14 = vpop.permute.xlu1 %2853  ;;  %2413 = vmatprep.mubr.msk.f32.mxu0 %vm1969_vm10, %v5126_v55  ;;  %v5631_v9 = vld [vmem:[#allocation25_spill] sm:$0xff]  ;;  %p3206_p2 = scmp.lt.s32.totalorder %s3204_s3, %s3198_s29 }
 0x116   : > { %3133 = vrot.lane.b32.xlu1 %v5627_v18, %s3282_s4  ;;  %v1905_v5 = vsel %vm1902_vm8, %v1872_v49, %v2830_v28  ;;  %v1906_v63 = vsel %vm1902_vm8, %v1873_v4, %v2831_v11  ;;  %v3137_v59 = vpack.i.bf16 %v4930_v7, %v4945_v36  ;;  %v1429_v42 = vsel %vm358_vm0, %v1427_v62, %v1428_v12 }
 0x117   : > { %v1938_v58 = vsel %vm1935_vm9, %v1905_v5, %v2840_v21  ;;  %v1939_v57 = vsel %vm1935_vm9, %v1906_v63, %v2841_v24  ;;  %v1431_v47 = vsel %vm358_vm0, %v1428_v12, %v1430_v15  ;;  %v1565_v29 = vsel %vm535_vm1, %v1563_v43, %v1564_v34  ;;  %v5089_v35 = vpop.permute.xlu0 %2848  ;;  %p3207_p3 = por %p3206_p2, %p3205_p1 }
 0x118   : > { %3128 = vrot.lane.b32.xlu0 %v3127_v45, %s3282_s4  ;;  %v2581_v45 = vunpack.i.h.bf16 %v4210_v6  ;;  %v2424_v16 = vpack.c.bf16 %v1939_v57, %v1938_v58  ;;  %v3152_v62 = vpack.i.bf16 %v1391_v19, %v4979_v61  ;;  %v1567_v12 = vsel %vm535_vm1, %v1564_v34, %v1566_v51  ;;  %v5628_v61 = vld [vmem:[#allocation5_spill] sm:$0xff] }
 0x119   : > { %v2580_v31 = vunpack.i.l.bf16 %v4210_v6  ;;  %v1605_v43 = vsel %vm535_vm1, %v1603_v1, %v1604_v37  ;;  %v1607_v25 = vsel %vm535_vm1, %v1604_v37, %v1606_v40  ;;  %v2621_v34 = vunpack.i.h.bf16 %v5628_v61  ;;  %v2864_v36 = vpop.permute.xlu1 %2863  ;;  %v3195_v1 = vld [vmem:[%s3362_s27 + $0x30] sm:$0xff]  ;;  %p3208_p5 = pnand %p3207_p3, %p3201_p0 }
 0x11a   : > { %3143 = vrot.lane.b32.xlu1 %v3142_v56, %s3283_s5  ;;  %v3194_v56 = vld [vmem:[%s3362_s27 + $0x38] sm:$0xff]  ;;  %v2620_v6 = vunpack.i.l.bf16 %v5628_v61  ;;  %2426 = vmatpush3.bf16.xpose.msk.msra.mxu0 %vm4898_vm11, %v2424_v16  ;;  %v3147_v7 = vpack.i.bf16 %v1431_v47, %v1429_v42  ;;  %v1709_v37 = vsel %vm1704_vm2, %v3195_v1, %v2540_v46  ;;  %v2661_v33 = vunpack.i.h.bf16 %v5629_v0  ;;  %s5339_s27 = scalar_lea.hbm %s5386_s2, %s2380_s24 }
 0x11b   : > { %v1710_v41 = vsel %vm1704_vm2, %v3194_v56, %v2541_v2  ;;  %v2660_v2 = vunpack.i.l.bf16 %v5629_v0  ;;  %v3162_v38 = vpack.i.bf16 %v1567_v12, %v1565_v29  ;;  %v1726_v39 = vsel %vm1704_vm2, %v3196_v50, %v2581_v45  ;;  %v2859_v26 = vpop.permute.xlu0 %2858 }
 0x11c   : > { %3138 = vrot.lane.b32.xlu0 %v3137_v59, %s3283_s5  ;;  %v2741_v3 = vunpack.i.h.bf16 %v5630_v54  ;;  %v2740_v48 = vunpack.i.l.bf16 %v5630_v54  ;;  %v3157_v46 = vpack.i.bf16 %v1607_v25, %v1605_v43  ;;  %v1725_v8 = vsel %vm1704_vm2, %v3197_v53, %v2580_v31 }
 0x11d   : > { %v2700_v23 = vunpack.i.l.bf16 %v5631_v9  ;;  %v2846_v30 = vunpack.i.h.bf16 %v5043_v60  ;;  %v2845_v13 = vunpack.i.l.bf16 %v5043_v60  ;;  %v1743_v17 = vsel %vm1737_vm3, %v1710_v41, %v2621_v34  ;;  %v2874_v44 = vpop.permute.xlu1 %2873 }
 0x11e   : > { %3153 = vrot.lane.b32.xlu1 %v3152_v62, %s3284_s6  ;;  %v1742_v11 = vsel %vm1737_vm3, %v1709_v37, %v2620_v6  ;;  %v2856_v28 = vunpack.i.h.bf16 %v5069_v14  ;;  %v2855_v27 = vunpack.i.l.bf16 %v5069_v14  ;;  %v1758_v32 = vsel %vm1737_vm3, %v1725_v8, %v2660_v2 }
 0x11f   : > { %v1759_v19 = vsel %vm1737_vm3, %v1726_v39, %v2661_v33  ;;  %v2866_v15 = vunpack.i.h.bf16 %v2864_v36  ;;  %v2865_v22 = vunpack.i.l.bf16 %v2864_v36  ;;  %v1791_v20 = vsel %vm1770_vm4, %v1758_v32, %v2740_v48  ;;  %v2869_v51 = vpop.permute.xlu0 %2868 }
 0x120   : > { %3148 = vrot.lane.b32.xlu0 %v3147_v7, %s3284_s6  ;;  %v1792_v60 = vsel %vm1770_vm4, %v1759_v19, %v2741_v3  ;;  %v2876_v10 = vunpack.i.h.bf16 %v2874_v44  ;;  %v2875_v18 = vunpack.i.l.bf16 %v2874_v44  ;;  %v2701_v40 = vunpack.i.h.bf16 %v5631_v9 }
 0x121   : > { %v1775_v49 = vsel %vm1770_vm4, %v1742_v11, %v2700_v23  ;;  %v1824_v4 = vsel %vm1803_vm5, %v1791_v20, %v2845_v13  ;;  %v1825_v24 = vsel %vm1803_vm5, %v1792_v60, %v2846_v30  ;;  %v2851_v63 = vunpack.i.h.bf16 %v5089_v35  ;;  %v2884_v59 = vpop.permute.xlu1 %2883  ;;  %v5633_v20 = vld [vmem:[#allocation24_spill] sm:$0xff] }
 0x122   : > { %3163 = vrot.lane.b32.xlu1 %v3162_v38, %s3285_s7  ;;  %v1857_v21 = vsel %vm1836_vm6, %v1824_v4, %v2855_v27  ;;  %v1858_v5 = vsel %vm1836_vm6, %v1825_v24, %v2856_v28  ;;  %v2850_v14 = vunpack.i.l.bf16 %v5089_v35  ;;  %v2886_v57 = vunpack.i.h.bf16 %v2884_v59  ;;  %v5635_v4 = vld [vmem:[#allocation30_spill] sm:$0xff] }
 0x123   : > { %v1890_v42 = vsel %vm1869_vm7, %v1857_v21, %v2865_v22  ;;  %v1891_v58 = vsel %vm1869_vm7, %v1858_v5, %v2866_v15  ;;  %v2885_v47 = vunpack.i.l.bf16 %v2884_v59  ;;  %v2861_v29 = vunpack.i.h.bf16 %v2859_v26  ;;  %v2879_v12 = vpop.permute.xlu0 %2878  ;;  %v5632_v15 = vld [vmem:[#allocation29_spill] sm:$0xff] }
 0x124   : > { %3158 = vrot.lane.b32.xlu0 %v3157_v46, %s3285_s7  ;;  %v2860_v45 = vunpack.i.l.bf16 %v2859_v26  ;;  %v1923_v16 = vsel %vm1902_vm8, %v1890_v42, %v2875_v18  ;;  %v1924_v62 = vsel %vm1902_vm8, %v1891_v58, %v2876_v10  ;;  %v2871_v31 = vunpack.i.h.bf16 %v2869_v51 }
 0x125   : > { %v2870_v43 = vunpack.i.l.bf16 %v2869_v51  ;;  %v1956_v35 = vsel %vm1935_vm9, %v1923_v16, %v2885_v47  ;;  %v1957_v25 = vsel %vm1935_vm9, %v1924_v62, %v2886_v57  ;;  %v1776_v56 = vsel %vm1770_vm4, %v1743_v17, %v2701_v40  ;;  %v2894_v6 = vpop.permute.xlu1 %2893  ;;  %v5634_v40 = vld [vmem:[#allocation35_spill] sm:$0xff] }
 0x126   : > { %v2427_v41 = vpack.c.bf16 %v1957_v25, %v1956_v35  ;;  %v2881_v61 = vunpack.i.h.bf16 %v2879_v12  ;;  %v2880_v34 = vunpack.i.l.bf16 %v2879_v12  ;;  %v1808_v36 = vsel %vm1803_vm5, %v1775_v49, %v2850_v14 }
 0x127   : > { %v1809_v7 = vsel %vm1803_vm5, %v1776_v56, %v2851_v63  ;;  %v1841_v1 = vsel %vm1836_vm6, %v1808_v36, %v2860_v45  ;;  %v2889_v0 = vpop.permute.xlu0 %2888  ;;  %v2896_v23 = vunpack.i.h.bf16 %v2894_v6  ;;  %v2895_v30 = vunpack.i.l.bf16 %v2894_v6 }
 0x128   : > { %v1842_v37 = vsel %vm1836_vm6, %v1809_v7, %v2861_v29  ;;  %2429 = vmatprep.subr.msk.bf16.mxu0 %vm4898_vm11, %v2427_v41  ;;  %v1874_v33 = vsel %vm1869_vm7, %v1841_v1, %v2870_v43  ;;  %v2891_v38 = vunpack.i.h.bf16 %v2889_v0  ;;  %v2890_v50 = vunpack.i.l.bf16 %v2889_v0 }
 0x129   : > { %v1875_v2 = vsel %vm1869_vm7, %v1842_v37, %v2871_v31  ;;  %v1907_v39 = vsel %vm1902_vm8, %v1874_v33, %v2880_v34  ;;  %v2904_v3 = vpop.permute.xlu1 %2903  ;;  %v1793_v22 = vsel %vm1770_vm4, %v5632_v15, %v2895_v30  ;;  %v1794_v60 = vsel %vm1770_vm4, %v5633_v20, %v2896_v23 }
 0x12a   : > { %v1908_v54 = vsel %vm1902_vm8, %v1875_v2, %v2881_v61  ;;  %v1940_v48 = vsel %vm1935_vm9, %v1907_v39, %v2890_v50  ;;  %v2906_v17 = vunpack.i.h.bf16 %v2904_v3  ;;  %v2905_v11 = vunpack.i.l.bf16 %v2904_v3 }
 0x12b   : > { %v1941_v26 = vsel %vm1935_vm9, %v1908_v54, %v2891_v38  ;;  %v2899_v53 = vpop.permute.xlu0 %2898 }
 0x12c   : > { %v2430_v46 = vpack.c.bf16 %v1941_v26, %v1940_v48  ;;  %v2901_v27 = vunpack.i.h.bf16 %v2899_v53  ;;  %v2900_v44 = vunpack.i.l.bf16 %v2899_v53  ;;  %v1810_v49 = vsel %vm1803_vm5, %v5634_v40, %v2905_v11  ;;  %v5636_v11 = vld [vmem:[#allocation7_spill] sm:$0xff] }
 0x12d   : > { %v2914_v8 = vpop.permute.xlu1 %2913  ;;  %v1811_v24 = vsel %vm1803_vm5, %v5635_v4, %v2906_v17 }
 0x12e   : > { %2432 = vmatpush3.bf16.xpose.msk.msra.mxu0 %vm4898_vm11, %v2430_v46  ;;  %v2916_v32 = vunpack.i.h.bf16 %v2914_v8  ;;  %v2915_v19 = vunpack.i.l.bf16 %v2914_v8  ;;  %v1827_v57 = vsel %vm1803_vm5, %v1794_v60, %v2901_v27  ;;  %v1826_v47 = vsel %vm1803_vm5, %v1793_v22, %v2900_v44  ;;  %v5637_v27 = vld [vmem:[#allocation32_spill] sm:$0xff] }
 0x12f   : > { %v2909_v9 = vpop.permute.xlu0 %2908 }
 0x130   : > { %v2911_v10 = vunpack.i.h.bf16 %v2909_v9  ;;  %v2910_v18 = vunpack.i.l.bf16 %v2909_v9  ;;  %v1843_v29 = vsel %vm1836_vm6, %v1810_v49, %v2915_v19  ;;  %v1844_v45 = vsel %vm1836_vm6, %v1811_v24, %v2916_v32 }
 0x131   : > { %v2924_v13 = vpop.permute.xlu1 %2923 }
 0x132   : > { %v2926_v21 = vunpack.i.h.bf16 %v2924_v13  ;;  %v2925_v5 = vunpack.i.l.bf16 %v2924_v13  ;;  %v1859_v16 = vsel %vm1836_vm6, %v1826_v47, %v2910_v18  ;;  %v1860_v62 = vsel %vm1836_vm6, %v1827_v57, %v2911_v10 }
 0x133   : > { %v2919_v28 = vpop.permute.xlu0 %2918 }
 0x134   : > { %v2921_v63 = vunpack.i.h.bf16 %v2919_v28  ;;  %v2920_v14 = vunpack.i.l.bf16 %v2919_v28  ;;  %v1876_v35 = vsel %vm1869_vm7, %v1843_v29, %v2925_v5  ;;  %v1877_v25 = vsel %vm1869_vm7, %v1844_v45, %v2926_v21 }
 0x135   : > { %v2934_v51 = vpop.permute.xlu1 %2933 }
 0x136   : > { %v2936_v59 = vunpack.i.h.bf16 %v2934_v51  ;;  %v2935_v42 = vunpack.i.l.bf16 %v2934_v51  ;;  %v1892_v61 = vsel %vm1869_vm7, %v1859_v16, %v2920_v14  ;;  %v1893_v34 = vsel %vm1869_vm7, %v1860_v62, %v2921_v63 }
 0x137   : > { %v2929_v58 = vpop.permute.xlu0 %2928 }
 0x138   : > { %v2931_v12 = vunpack.i.h.bf16 %v2929_v58  ;;  %v2930_v31 = vunpack.i.l.bf16 %v2929_v58  ;;  %v1909_v6 = vsel %vm1902_vm8, %v1876_v35, %v2935_v42  ;;  %v1910_v36 = vsel %vm1902_vm8, %v1877_v25, %v2936_v59 }
 0x13a   : > { %v1925_v2 = vsel %vm1902_vm8, %v1892_v61, %v2930_v31  ;;  %v1926_v38 = vsel %vm1902_vm8, %v1893_v34, %v2931_v12  ;;  %v5639_v34 = vld [vmem:[#allocation36_spill] sm:$0xff] }
 0x13b   : > { %v2944_v43 = vpop.permute.xlu1 %2943 }
 0x13c   : > { %v2946_v56 = vunpack.i.h.bf16 %v2944_v43  ;;  %v2945_v41 = vunpack.i.l.bf16 %v2944_v43  ;;  %v2939_v7 = vpop.permute.xlu0 %2938 }
 0x13d   : > { %v2941_v0 = vunpack.i.h.bf16 %v2939_v7  ;;  %v2940_v33 = vunpack.i.l.bf16 %v2939_v7 }
 0x13e   : > { %v1942_v1 = vsel %vm1935_vm9, %v1909_v6, %v2945_v41  ;;  %v1943_v37 = vsel %vm1935_vm9, %v1910_v36, %v2946_v56  ;;  %v5638_v41 = vld [vmem:[#allocation11_spill] sm:$0xff] }
 0x13f   : > { %v2436_v50 = vpack.c.bf16 %v1943_v37, %v1942_v1  ;;  %v2954_v39 = vpop.permute.xlu1 %2953  ;;  %v1958_v54 = vsel %vm1935_vm9, %v1925_v2, %v2940_v33  ;;  %v1959_v3 = vsel %vm1935_vm9, %v1926_v38, %v2941_v0 }
 0x140   : > { %v2433_v48 = vpack.c.bf16 %v1959_v3, %v1958_v54  ;;  %v2949_v26 = vpop.permute.xlu0 %2948  ;;  %v2956_v13 = vunpack.i.h.bf16 %v2954_v39  ;;  %v2955_v17 = vunpack.i.l.bf16 %v2954_v39 }
 0x141   : > { %v2951_v8 = vunpack.i.h.bf16 %v2949_v26  ;;  %v2950_v9 = vunpack.i.l.bf16 %v2949_v26 }
 0x142   : > { %2435 = vmatprep.subr.msk.bf16.mxu0 %vm4898_vm11, %v2433_v48 }
 0x143   : > { %v2964_v46 = vpop.permute.xlu1 %2963  ;;  %2438 = vmatpush3.bf16.xpose.msk.msra.mxu0 %vm4898_vm11, %v2436_v50  ;;  %v1795_v28 = vsel %vm1770_vm4, %v5636_v11, %v2950_v9  ;;  %v1796_v44 = vsel %vm1770_vm4, %v5637_v27, %v2951_v8 }
 0x144   : > { %v2959_v53 = vpop.permute.xlu0 %2958  ;;  %v2966_v32 = vunpack.i.h.bf16 %v2964_v46  ;;  %v2965_v19 = vunpack.i.l.bf16 %v2964_v46  ;;  %v1828_v51 = vsel %vm1803_vm5, %v1795_v28, %v2955_v17  ;;  %v1829_v40 = vsel %vm1803_vm5, %v1796_v44, %v2956_v13 }
 0x145   : > { %v2961_v24 = vunpack.i.h.bf16 %v2959_v53  ;;  %v2960_v21 = vunpack.i.l.bf16 %v2959_v53 }
 0x146   : > { %v1861_v49 = vsel %vm1836_vm6, %v1828_v51, %v2965_v19  ;;  %v1862_v4 = vsel %vm1836_vm6, %v1829_v40, %v2966_v32  ;;  %v5640_v32 = vld [vmem:[#allocation10_spill] sm:$0xff]  ;;  %v5643_v40 = vld [vmem:[#allocation9_spill] sm:$0xff] }
 0x147   : > { %v2974_v23 = vpop.permute.xlu1 %2973  ;;  %v1812_v61 = vsel %vm1803_vm5, %v5638_v41, %v2960_v21  ;;  %v1813_v6 = vsel %vm1803_vm5, %v5639_v34, %v2961_v24 }
 0x148   : > { %v2976_v22 = vunpack.i.h.bf16 %v2974_v23  ;;  %v2975_v20 = vunpack.i.l.bf16 %v2974_v23 }
 0x149   : > { %v2969_v30 = vpop.permute.xlu0 %2968 }
 0x14a   : > { %v1894_v63 = vsel %vm1869_vm7, %v1861_v49, %v2975_v20  ;;  %v1895_v14 = vsel %vm1869_vm7, %v1862_v4, %v2976_v22  ;;  %v2971_v58 = vunpack.i.h.bf16 %v2969_v30  ;;  %v2970_v57 = vunpack.i.l.bf16 %v2969_v30 }
 0x14b   : > { %v2984_v15 = vpop.permute.xlu1 %2983 }
 0x14c   : > { %v2986_v60 = vunpack.i.h.bf16 %v2984_v15  ;;  %v2985_v10 = vunpack.i.l.bf16 %v2984_v15  ;;  %v1845_v36 = vsel %vm1836_vm6, %v1812_v61, %v2970_v57  ;;  %v1846_v7 = vsel %vm1836_vm6, %v1813_v6, %v2971_v58  ;;  %v5641_v15 = vld [vmem:[#allocation8_spill] sm:$0xff] }
 0x14d   : > { %v2979_v18 = vpop.permute.xlu0 %2978 }
 0x14e   : > { %v1927_v47 = vsel %vm1902_vm8, %v1894_v63, %v2985_v10  ;;  %v1928_v29 = vsel %vm1902_vm8, %v1895_v14, %v2986_v60  ;;  %v2981_v16 = vunpack.i.h.bf16 %v2979_v18  ;;  %v2980_v62 = vunpack.i.l.bf16 %v2979_v18  ;;  %v5642_v18 = vld [vmem:[#allocation38_spill] sm:$0xff] }
 0x14f   : > { %v2994_v5 = vpop.permute.xlu1 %2993 }
 0x150   : > { %v2996_v59 = vunpack.i.h.bf16 %v2994_v5  ;;  %v2995_v42 = vunpack.i.l.bf16 %v2994_v5  ;;  %v1878_v37 = vsel %vm1869_vm7, %v1845_v36, %v2980_v62  ;;  %v1879_v0 = vsel %vm1869_vm7, %v1846_v7, %v2981_v16 }
 0x151   : > { %v2989_v45 = vpop.permute.xlu0 %2988 }
 0x152   : > { %v1960_v12 = vsel %vm1935_vm9, %v1927_v47, %v2995_v42  ;;  %v1961_v31 = vsel %vm1935_vm9, %v1928_v29, %v2996_v59  ;;  %v2991_v35 = vunpack.i.h.bf16 %v2989_v45  ;;  %v2990_v25 = vunpack.i.l.bf16 %v2989_v45 }
 0x153   : > { %v2439_v43 = vpack.c.bf16 %v1961_v31, %v1960_v12  ;;  %v3004_v56 = vpop.permute.xlu1 %3003 }
 0x154   : > { %v1911_v38 = vsel %vm1902_vm8, %v1878_v37, %v2990_v25  ;;  %v1912_v50 = vsel %vm1902_vm8, %v1879_v0, %v2991_v35  ;;  %v3006_v8 = vunpack.i.h.bf16 %v3004_v56  ;;  %v3005_v9 = vunpack.i.l.bf16 %v3004_v56 }
 0x155   : > { %v2999_v1 = vpop.permute.xlu0 %2998  ;;  %2441 = vmatprep.subr.msk.bf16.mxu0 %vm4898_vm11, %v2439_v43 }
 0x156   : > { %v3001_v33 = vunpack.i.h.bf16 %v2999_v1  ;;  %v3000_v2 = vunpack.i.l.bf16 %v2999_v1  ;;  %v1797_v19 = vsel %vm1770_vm4, %v5640_v32, %v3005_v9  ;;  %v1798_v22 = vsel %vm1770_vm4, %v5641_v15, %v3006_v8 }
 0x157   : > { %v3014_v39 = vpop.permute.xlu1 %3013 }
 0x158   : > { %v1944_v54 = vsel %vm1935_vm9, %v1911_v38, %v3000_v2  ;;  %v1945_v3 = vsel %vm1935_vm9, %v1912_v50, %v3001_v33  ;;  %v3016_v30 = vunpack.i.h.bf16 %v3014_v39  ;;  %v3015_v13 = vunpack.i.l.bf16 %v3014_v39 }
 0x159   : > { %v2442_v48 = vpack.c.bf16 %v1945_v3, %v1944_v54  ;;  %v3009_v26 = vpop.permute.xlu0 %3008 }
 0x15a   : > { %v3011_v11 = vunpack.i.h.bf16 %v3009_v26  ;;  %v3010_v28 = vunpack.i.l.bf16 %v3009_v26  ;;  %v1814_v51 = vsel %vm1803_vm5, %v5642_v18, %v3015_v13  ;;  %v1815_v49 = vsel %vm1803_vm5, %v5643_v40, %v3016_v30  ;;  %v5644_v13 = vld [vmem:[#allocation20_spill] sm:$0xff] }
 0x15b   : > { %2444 = vmatpush3.bf16.xpose.msk.msra.mxu0 %vm4898_vm11, %v2442_v48  ;;  %v3024_v46 = vpop.permute.xlu1 %3023 }
 0x15c   : > { %v3026_v27 = vunpack.i.h.bf16 %v3024_v46  ;;  %v3025_v44 = vunpack.i.l.bf16 %v3024_v46  ;;  %v1831_v42 = vsel %vm1803_vm5, %v1798_v22, %v3011_v11  ;;  %v1830_v58 = vsel %vm1803_vm5, %v1797_v19, %v3010_v28  ;;  %v5645_v11 = vld [vmem:[#allocation22_spill] sm:$0xff] }
 0x15d   : > { %v3019_v53 = vpop.permute.xlu0 %3018 }
 0x15e   : > { %v3021_v20 = vunpack.i.h.bf16 %v3019_v53  ;;  %v3020_v60 = vunpack.i.l.bf16 %v3019_v53  ;;  %v1847_v57 = vsel %vm1836_vm6, %v1814_v51, %v3025_v44  ;;  %v1848_v47 = vsel %vm1836_vm6, %v1815_v49, %v3026_v27 }
 0x15f   : > { %v3034_v23 = vpop.permute.xlu1 %3033 }
 0x160   : > { %v3036_v4 = vunpack.i.h.bf16 %v3034_v23  ;;  %v3035_v24 = vunpack.i.l.bf16 %v3034_v23  ;;  %v1863_v29 = vsel %vm1836_vm6, %v1830_v58, %v3020_v60  ;;  %v1864_v45 = vsel %vm1836_vm6, %v1831_v42, %v3021_v20 }
 0x161   : > { %v3029_v17 = vpop.permute.xlu0 %3028 }
 0x162   : > { %v3031_v21 = vunpack.i.h.bf16 %v3029_v17  ;;  %v3030_v5 = vunpack.i.l.bf16 %v3029_v17  ;;  %v1880_v31 = vsel %vm1869_vm7, %v1847_v57, %v3035_v24  ;;  %v1881_v43 = vsel %vm1869_vm7, %v1848_v47, %v3036_v4 }
 0x163   : > { %v3044_v10 = vpop.permute.xlu1 %3043 }
 0x164   : > { %v3046_v63 = vunpack.i.h.bf16 %v3044_v10  ;;  %v3045_v14 = vunpack.i.l.bf16 %v3044_v10  ;;  %v1896_v56 = vsel %vm1869_vm7, %v1863_v29, %v3030_v5  ;;  %v1897_v41 = vsel %vm1869_vm7, %v1864_v45, %v3031_v21 }
 0x165   : > { %v3039_v59 = vpop.permute.xlu0 %3038 }
 0x166   : > { %v3041_v16 = vunpack.i.h.bf16 %v3039_v59  ;;  %v3040_v62 = vunpack.i.l.bf16 %v3039_v59  ;;  %v1913_v61 = vsel %vm1902_vm8, %v1880_v31, %v3045_v14  ;;  %v1914_v34 = vsel %vm1902_vm8, %v1881_v43, %v3046_v63 }
 0x167   : > { %v3054_v12 = vpop.permute.xlu1 %3053 }
 0x168   : > { %v3056_v35 = vunpack.i.h.bf16 %v3054_v12  ;;  %v3055_v25 = vunpack.i.l.bf16 %v3054_v12  ;;  %v1929_v0 = vsel %vm1902_vm8, %v1896_v56, %v3040_v62  ;;  %v1930_v33 = vsel %vm1902_vm8, %v1897_v41, %v3041_v16  ;;  %v5647_v41 = vld [vmem:[#allocation44_spill] sm:$0xff] }
 0x169   : > { %v3049_v6 = vpop.permute.xlu0 %3048 }
 0x16a   : > { %v1946_v36 = vsel %vm1935_vm9, %v1913_v61, %v3055_v25  ;;  %v1947_v7 = vsel %vm1935_vm9, %v1914_v34, %v3056_v35  ;;  %v3051_v1 = vunpack.i.h.bf16 %v3049_v6  ;;  %v3050_v37 = vunpack.i.l.bf16 %v3049_v6  ;;  %v5646_v25 = vld [vmem:[#allocation33_spill] sm:$0xff] }
 0x16b   : > { %v2448_v2 = vpack.c.bf16 %v1947_v7, %v1946_v36  ;;  %v3064_v38 = vpop.permute.xlu1 %3063 }
 0x16c   : > { %v1962_v50 = vsel %vm1935_vm9, %v1929_v0, %v3050_v37  ;;  %v1963_v39 = vsel %vm1935_vm9, %v1930_v33, %v3051_v1  ;;  %v3066_v23 = vunpack.i.h.bf16 %v3064_v38  ;;  %v3065_v30 = vunpack.i.l.bf16 %v3064_v38 }
 0x16d   : > { %v2445_v54 = vpack.c.bf16 %v1963_v39, %v1962_v50  ;;  %v3059_v3 = vpop.permute.xlu0 %3058 }
 0x16e   : > { %v3061_v46 = vunpack.i.h.bf16 %v3059_v3  ;;  %v3060_v53 = vunpack.i.l.bf16 %v3059_v3 }
 0x16f   : > { %2447 = vmatprep.subr.msk.bf16.mxu0 %vm4898_vm11, %v2445_v54  ;;  %v3074_v48 = vpop.permute.xlu1 %3073 }
 0x170   : > { %2450 = vmatpush3.bf16.xpose.msk.msra.mxu0 %vm4898_vm11, %v2448_v2  ;;  %v1799_v17 = vsel %vm1770_vm4, %v5644_v13, %v3060_v53  ;;  %v1800_v28 = vsel %vm1770_vm4, %v5645_v11, %v3061_v46  ;;  %v3076_v27 = vunpack.i.h.bf16 %v3074_v48  ;;  %v3075_v44 = vunpack.i.l.bf16 %v3074_v48 }
 0x171   : > { %v3069_v26 = vpop.permute.xlu0 %3068  ;;  %v1832_v10 = vsel %vm1803_vm5, %v1799_v17, %v3065_v30  ;;  %v1833_v18 = vsel %vm1803_vm5, %v1800_v28, %v3066_v23 }
 0x172   : > { %v1865_v51 = vsel %vm1836_vm6, %v1832_v10, %v3075_v44  ;;  %v1866_v40 = vsel %vm1836_vm6, %v1833_v18, %v3076_v27  ;;  %v3071_v49 = vunpack.i.h.bf16 %v3069_v26  ;;  %v3070_v4 = vunpack.i.l.bf16 %v3069_v26  ;;  %v5648_v27 = vld [vmem:[#allocation15_spill] sm:$0xff]  ;;  %v5651_v18 = vld [vmem:[#allocation42_spill] sm:$0xff] }
 0x173   : > { %v3084_v8 = vpop.permute.xlu1 %3083 }
 0x174   : > { %v3086_v19 = vunpack.i.h.bf16 %v3084_v8  ;;  %v3085_v15 = vunpack.i.l.bf16 %v3084_v8  ;;  %v1816_v56 = vsel %vm1803_vm5, %v5646_v25, %v3070_v4  ;;  %v1817_v61 = vsel %vm1803_vm5, %v5647_v41, %v3071_v49 }
 0x175   : > { %v3079_v9 = vpop.permute.xlu0 %3078 }
 0x176   : > { %v1898_v21 = vsel %vm1869_vm7, %v1865_v51, %v3085_v15  ;;  %v1899_v5 = vsel %vm1869_vm7, %v1866_v40, %v3086_v19  ;;  %v3081_v59 = vunpack.i.h.bf16 %v3079_v9  ;;  %v3080_v42 = vunpack.i.l.bf16 %v3079_v9 }
 0x177   : > { %v3094_v32 = vpop.permute.xlu1 %3093 }
 0x178   : > { %v3096_v22 = vunpack.i.h.bf16 %v3094_v32  ;;  %v3095_v20 = vunpack.i.l.bf16 %v3094_v32  ;;  %v1849_v34 = vsel %vm1836_vm6, %v1816_v56, %v3080_v42  ;;  %v1850_v6 = vsel %vm1836_vm6, %v1817_v61, %v3081_v59  ;;  %v5649_v32 = vld [vmem:[#allocation13_spill] sm:$0xff] }
 0x179   : > { %v3089_v60 = vpop.permute.xlu0 %3088 }
 0x17a   : > { %v1931_v58 = vsel %vm1902_vm8, %v1898_v21, %v3095_v20  ;;  %v1932_v57 = vsel %vm1902_vm8, %v1899_v5, %v3096_v22  ;;  %v3091_v29 = vunpack.i.h.bf16 %v3089_v60  ;;  %v3090_v45 = vunpack.i.l.bf16 %v3089_v60  ;;  %v5650_v60 = vld [vmem:[#allocation40_spill] sm:$0xff] }
 0x17b   : > { %v3104_v24 = vpop.permute.xlu1 %3103 }
 0x17c   : > { %v3106_v63 = vunpack.i.h.bf16 %v3104_v24  ;;  %v3105_v14 = vunpack.i.l.bf16 %v3104_v24  ;;  %v1882_v7 = vsel %vm1869_vm7, %v1849_v34, %v3090_v45  ;;  %v1883_v1 = vsel %vm1869_vm7, %v1850_v6, %v3091_v29 }
 0x17d   : > { %v3099_v47 = vpop.permute.xlu0 %3098 }
 0x17e   : > { %v1964_v16 = vsel %vm1935_vm9, %v1931_v58, %v3105_v14  ;;  %v1965_v62 = vsel %vm1935_vm9, %v1932_v57, %v3106_v63  ;;  %v3101_v31 = vunpack.i.h.bf16 %v3099_v47  ;;  %v3100_v43 = vunpack.i.l.bf16 %v3099_v47 }
 0x17f   : > { %v2451_v12 = vpack.c.bf16 %v1965_v62, %v1964_v16  ;;  %v3114_v35 = vpop.permute.xlu1 %3113 }
 0x180   : > { %v1915_v33 = vsel %vm1902_vm8, %v1882_v7, %v3100_v43  ;;  %v1916_v2 = vsel %vm1902_vm8, %v1883_v1, %v3101_v31  ;;  %v3116_v46 = vunpack.i.h.bf16 %v3114_v35  ;;  %v3115_v53 = vunpack.i.l.bf16 %v3114_v35 }
 0x181   : > { %2453 = vmatprep.subr.msk.bf16.mxu0 %vm4898_vm11, %v2451_v12 }
 0x182   : > { %v3109_v36 = vpop.permute.xlu0 %3108  ;;  %v1801_v44 = vsel %vm1770_vm4, %v5648_v27, %v3115_v53  ;;  %v1802_v19 = vsel %vm1770_vm4, %v5649_v32, %v3116_v46 }
 0x183   : > { %v3111_v37 = vunpack.i.h.bf16 %v3109_v36  ;;  %v3110_v0 = vunpack.i.l.bf16 %v3109_v36 }
 0x184   : > { %v3124_v38 = vpop.permute.xlu1 %3123 }
 0x185   : > { %v1948_v50 = vsel %vm1935_vm9, %v1915_v33, %v3110_v0  ;;  %v1949_v39 = vsel %vm1935_vm9, %v1916_v2, %v3111_v37  ;;  %v3126_v9 = vunpack.i.h.bf16 %v3124_v38  ;;  %v3125_v23 = vunpack.i.l.bf16 %v3124_v38 }
 0x186   : > { %v2454_v54 = vpack.c.bf16 %v1949_v39, %v1948_v50  ;;  %v3119_v3 = vpop.permute.xlu0 %3118 }
 0x187   : > { %v3121_v13 = vunpack.i.h.bf16 %v3119_v3  ;;  %v3120_v17 = vunpack.i.l.bf16 %v3119_v3  ;;  %v1818_v10 = vsel %vm1803_vm5, %v5650_v60, %v3125_v23  ;;  %v1819_v51 = vsel %vm1803_vm5, %v5651_v18, %v3126_v9 }
 0x188   : > { %2456 = vmatpush3.bf16.xpose.msk.msra.mxu0 %vm4898_vm11, %v2454_v54  ;;  %v3134_v48 = vpop.permute.xlu1 %3133 }
 0x189   : > { %v3136_v11 = vunpack.i.h.bf16 %v3134_v48  ;;  %v3135_v28 = vunpack.i.l.bf16 %v3134_v48  ;;  %v1835_v14 = vsel %vm1803_vm5, %v1802_v19, %v3121_v13  ;;  %v1834_v59 = vsel %vm1803_vm5, %v1801_v44, %v3120_v17 }
 0x18a   : > { %v3129_v26 = vpop.permute.xlu0 %3128 }
 0x18b   : > { %v3131_v15 = vunpack.i.h.bf16 %v3129_v26  ;;  %v3130_v22 = vunpack.i.l.bf16 %v3129_v26  ;;  %v1851_v42 = vsel %vm1836_vm6, %v1818_v10, %v3135_v28  ;;  %v1852_v58 = vsel %vm1836_vm6, %v1819_v51, %v3136_v11 }
 0x18c   : > { %v3144_v8 = vpop.permute.xlu1 %3143 }
 0x18d   : > { %v3146_v40 = vunpack.i.h.bf16 %v3144_v8  ;;  %v3145_v49 = vunpack.i.l.bf16 %v3144_v8  ;;  %v1867_v57 = vsel %vm1836_vm6, %v1834_v59, %v3130_v22  ;;  %v1868_v47 = vsel %vm1836_vm6, %v1835_v14, %v3131_v15 }
 0x18e   : > { %v3139_v30 = vpop.permute.xlu0 %3138 }
 0x18f   : > { %v3141_v4 = vunpack.i.h.bf16 %v3139_v30  ;;  %v3140_v24 = vunpack.i.l.bf16 %v3139_v30  ;;  %v1884_v62 = vsel %vm1869_vm7, %v1851_v42, %v3145_v49  ;;  %v1885_v12 = vsel %vm1869_vm7, %v1852_v58, %v3146_v40 }
 0x190   : > { %v3154_v20 = vpop.permute.xlu1 %3153 }
 0x191   : > { %v3156_v21 = vunpack.i.h.bf16 %v3154_v20  ;;  %v3155_v5 = vunpack.i.l.bf16 %v3154_v20  ;;  %v1900_v35 = vsel %vm1869_vm7, %v1867_v57, %v3140_v24  ;;  %v1901_v25 = vsel %vm1869_vm7, %v1868_v47, %v3141_v4 }
 0x192   : > { %v3149_v63 = vpop.permute.xlu0 %3148 }
 0x193   : > { %v3151_v29 = vunpack.i.h.bf16 %v3149_v63  ;;  %v3150_v45 = vunpack.i.l.bf16 %v3149_v63  ;;  %v1917_v56 = vsel %vm1902_vm8, %v1884_v62, %v3155_v5  ;;  %v1918_v41 = vsel %vm1902_vm8, %v1885_v12, %v3156_v21 }
 0x194   : > { %v3164_v16 = vpop.permute.xlu1 %3163 }
 0x195   : > { %v3166_v31 = vunpack.i.h.bf16 %v3164_v16  ;;  %v3165_v43 = vunpack.i.l.bf16 %v3164_v16  ;;  %v1933_v1 = vsel %vm1902_vm8, %v1900_v35, %v3150_v45  ;;  %v1934_v37 = vsel %vm1902_vm8, %v1901_v25, %v3151_v29 }
 0x196   : > { %v3159_v61 = vpop.permute.xlu0 %3158 }
 0x197   : > { %v1950_v34 = vsel %vm1935_vm9, %v1917_v56, %v3165_v43  ;;  %v1951_v6 = vsel %vm1935_vm9, %v1918_v41, %v3166_v31  ;;  %v3161_v36 = vunpack.i.h.bf16 %v3159_v61  ;;  %v3160_v7 = vunpack.i.l.bf16 %v3159_v61 }
 0x198   : > { %v2460_v0 = vpack.c.bf16 %v1951_v6, %v1950_v34 }
 0x199   : > { %v1966_v33 = vsel %vm1935_vm9, %v1933_v1, %v3160_v7  ;;  %v1967_v2 = vsel %vm1935_vm9, %v1934_v37, %v3161_v36 }
 0x19a   : > { %v2457_v38 = vpack.c.bf16 %v1967_v2, %v1966_v33 }
 0x19c   : > { %2459 = vmatprep.subr.msk.bf16.mxu0 %vm4898_vm11, %v2457_v38 }
 0x19d   : > { %2462 = vmatpush3.bf16.xpose.msk.msra.mxu0 %vm4898_vm11, %v2460_v0 }
 0x1a4   : > { %2414 = vmatmul.mubr.msk.f32.vlgmr.msra.gmra.mrb[0].mxu0 %vm1969_vm10, %v5126_v55 }
 0x277   : > { %v2135_v50 = vpop.f32.mrb[0].mxu0 }
 0x278   : > { %2140 = vst [vmem:[%s150_s20] sm:$0xff] %v2135_v50  ;;  %v2137_v52 = vpop.f32.mrb[1].mxu0 }
 0x279   : > { %2141 = vst [vmem:[%s150_s20 + $0x8] sm:$0xff] %v2137_v52 }
 0x27a   : > { %3211 = shalt.err (!%p3208_p5)
}
 0x27b   : > { %s3212_s4 = scalar_lea.hbm %s5339_s27, 256  ;;  %s3216_s7 = scalar_lea.hbm %s5386_s2, 512 }
 0x27c   : > { %p3213_p6 = scmp.ne.s32.totalorder %s5339_s27, %s3212_s4  ;;  %p3217_p10 = scmp.lt.u32.totalorder %s5339_s27, %s5386_s2 }
 0x27d   : > { %p3218_p11 = scmp.lt.u32.totalorder %s3216_s7, %s3212_s4  ;;  %p3220_p13 = scmp.lt.u32.totalorder %s3212_s4, %s5339_s27 }
 0x27e   : > { %p3214_p7 = pnand %p3213_p6, %p3342_p4 }
 0x27f   : > { %p3219_p12 = por %p3218_p11, %p3217_p10 }
 0x280   : > { %p3215_p9 = pneg %p3214_p7 }
 0x281   : > { %p3221_p0 = por %p3220_p13, %p3219_p12 }
 0x283   : > { %p3222_p1 = pnand %p3221_p0, %p3215_p9 }
 0x285   : > { %3225 = shalt.err (!%p3222_p1)
}
 0x286   : > { %2464 = dma.vmem_to_hbm [thread:$0]  (%p3342_p4), %s5334_s23, 256, %s5339_s27, %s2143_s28  }
 0x287 PF: > { %p2470_p2 = scmp.ge.s32.totalorder %s3276_s14, 2  ;;  %s2171_s16 = sand.u32 1, %s3256_s9  }
 0x288   : > { %s2172_s18 = scalar_lea.sflag [#allocation3], %s2171_s16 }
 0x289   : > { %p2467_p3 = pnand %p2470_p2, %p3349_p8 }
 0x28b   : > { %3251 = dma.done.wait (!%p2467_p3), %s2172_s18, 256  }
 0x28c   : > { %3253 = vsyncadd (!%p2467_p3), %s2172_s18, 4294967040  ;;  %s15_s14 = sadd.s32 1, %s3276_s14   ;;  %s5652_s9 = smov %s3260_s10 }
 0x28d   : > { %p12_p5 = scmp.ge.s32.totalorder %s15_s14, 4   ;;  %s5653_s10 = smov %s3264_s11 }
 0x28e   : > { %s5654_s11 = smov %s3355_s22  ;;  %s5655_s12 = smov %s3272_s13 }
 0x28f   : > { %s5656_s13 = smov %s5658_s17  ;;  %14 = sbr.rel (!%p12_p5) target bundleno = 4 (0x4), region = 66 }
 0x296   :  { %2177 = vsyncpa [#allocation3], 1 }
 0x297   :  { %2179 = vsyncpa [#allocation3 + $0x1], 1 }

</bundles_post_ra>
